<compile_context>
chip_gen: v5e
topology: v5e:2x2
jax: 0.10.0
libtpu: 0.0.40
codegen_flags: <defaults>
</compile_context>

<pallas_src>
import numpy as np
from functools import partial

import jax
import jax.numpy as jnp
from jax import lax
from jax.experimental import pallas as pl
from jax.experimental.pallas import tpu as pltpu


# ----------------------------------------------------------------------------
# Fused kernel: BiLSTM recurrence + hidden2tag + Viterbi forward + backtrace
# ----------------------------------------------------------------------------
def make_fused_kernel(T, H, NT, start_ix):
    NT_F = float(NT)  # python literals only inside the kernel

    def kernel(x_ref, wih2_ref, whh_ref, wtag_ref, small_ref, trans_ref,
               feats_ref, path_ref, score_ref,
               hf_ref, hb_ref, bptr_ref):
        H2, H4, H6, H8 = 2 * H, 4 * H, 6 * H, 8 * H

        # ---- 1. hoisted input projection (off the serial chain): one (T,E)@(E,16H) matmul.
        xw = jnp.dot(x_ref[...], wih2_ref[...], preferred_element_type=jnp.float32)  # (T,16H)
        xw_f = xw[:, 0:H8] + small_ref[0:1, :]      # fused bias (both directions) folded once
        xw_b = xw[:, H8:2 * H8]

        whh_bd = whh_ref[...]                       # (2H, 8H) block-diagonal recurrent weight
        h = small_ref[1:2, 0:H2]                    # [h0_f | h0_b]
        c = small_ref[2:3, 0:H2]                    # [c0_f | c0_b]

        # ---- 2. fused bidirectional recurrence:
        #         one (1,2H)@(2H,8H) MXU push + 3 EUP pushes per time step.
        for s in range(T):                          # static unroll, T is small
            tb = T - 1 - s
            pre = xw_f[s:s + 1, :] + xw_b[tb:tb + 1, :]        # (1,8H), off the h->h chain
            gates = pre + jnp.dot(h, whh_bd, preferred_element_type=jnp.float32)
            sig = jax.nn.sigmoid(gates)                        # one EUP pass over all gates
            i = sig[:, 0:H2]
            f = sig[:, H2:H4]
            o = sig[:, H6:H8]
            g = jnp.tanh(gates[:, H4:H6])
            c = f * c + i * g
            h = o * jnp.tanh(c)
            hf_ref[s:s + 1, :] = h[:, 0:H]                     # forward hidden at time s
            hb_ref[tb:tb + 1, :] = h[:, H:H2]                  # backward hidden at time T-1-s

        # ---- 3. hidden2tag: two batched (T,H)@(H,NT) matmuls with the split weight.
        wtag = wtag_ref[...]
        feats = (jnp.dot(hf_ref[...], wtag[0:H, :], preferred_element_type=jnp.float32)
                 + jnp.dot(hb_ref[...], wtag[H:H2, :], preferred_element_type=jnp.float32)
                 + small_ref[3:4, 0:NT])
        feats_ref[...] = feats

        # ---- 4. Viterbi forward recurrence (f32). Backpointers are computed here, off the
        #         fv serial chain, and stored; the backtrace then never touches `trans`.
        idx_row = lax.broadcasted_iota(jnp.int32, (1, NT), 1).astype(jnp.float32)
        sub_iota = lax.broadcasted_iota(jnp.int32, (NT, NT), 0).astype(jnp.float32)
        fv = jnp.where(idx_row == float(start_ix), 0.0, -10000.0)        # (1, NT)
        trans = trans_ref[...]                                           # (NT, NT) [prev,next]
        for t in range(T):
            nv = jnp.transpose(fv) + trans                               # (NT, NT)
            m = jnp.max(nv, axis=0, keepdims=True)                       # (1, NT)
            # first argmax over prev tag (matches np.argmax); does not feed fv.
            bptr_ref[t:t + 1, :] = jnp.min(jnp.where(nv == m, sub_iota, NT_F),
                                           axis=0, keepdims=True)
            fv = m + feats[t:t + 1, :]
        term = fv + small_ref[3:4, NT:2 * NT]                            # + trans[:, STOP]

        # ---- 5. terminal argmax + backtrace: pure VPU selects on the stored backpointers.
        def first_argmax(row):
            mx = jnp.max(row, axis=1, keepdims=True)                                   # (1,1)
            idx = jnp.min(jnp.where(row == mx, idx_row, NT_F), axis=1, keepdims=True)  # (1,1)
            onehot = jnp.where(idx_row == idx, 1.0, 0.0)                               # (1,NT)
            return mx, idx, onehot

        best_val, best_idx, cur = first_argmax(term)
        score_ref[...] = best_val

        t_iota = lax.broadcasted_iota(jnp.int32, (1, T), 1).astype(jnp.float32)
        path_acc = jnp.where(t_iota == float(T - 1), best_idx, 0.0)      # (1, T) lane row
        for t in range(T - 1, 0, -1):                                    # static unroll
            bp_row = bptr_ref[t:t + 1, :]                                # (1, NT)
            idx = jnp.max(jnp.where(cur > 0.5, bp_row, -1.0), axis=1, keepdims=True)
            cur = jnp.where(idx_row == idx, 1.0, 0.0)
            path_acc = jnp.where(t_iota == float(t - 1), idx, path_acc)
        path_ref[...] = path_acc.astype(jnp.int32)                       # single store

    return kernel


# ----------------------------------------------------------------------------
# jitted wrapper: embedding gather + fused pallas_call
# ----------------------------------------------------------------------------
@partial(jax.jit, static_argnames=("start_ix",))
def _forward_impl(sentence, embed, wih2, whh_bd, wtag, smalls, trans, *, start_ix):
    T = sentence.shape[0]
    H = whh_bd.shape[0] // 2
    NT = trans.shape[0]
    # TODO(synk): the embedding gather stays in XLA; it could move in-kernel via
    # PrefetchScalarGridSpec scalar-prefetch of `sentence`, but at T=8 it is not worth it.
    x_emb = jnp.take(embed, sentence, axis=0)

    kernel = make_fused_kernel(T, H, NT, start_ix)
    vmem = pl.BlockSpec(memory_space=pltpu.MemorySpace.VMEM)
    args = (x_emb, wih2, whh_bd, wtag, smalls, trans)
    feats, path, score = pl.pallas_call(
        kernel,
        out_shape=(jax.ShapeDtypeStruct((T, NT), jnp.float32),
                   jax.ShapeDtypeStruct((1, T), jnp.int32),
                   jax.ShapeDtypeStruct((1, 1), jnp.float32)),
        in_specs=[vmem] * len(args),
        out_specs=(vmem, vmem, vmem),
        scratch_shapes=[pltpu.VMEM((T, H), jnp.float32),    # forward hidden states
                        pltpu.VMEM((T, H), jnp.float32),    # backward hidden states
                        pltpu.VMEM((T, NT), jnp.float32)],  # per-step Viterbi backpointers
    )(*args)
    return feats, path, score


def bilstm_crf_forward(sentence, packed, tag_to_ix):
    feats, path, score = _forward_impl(
        sentence, packed['embed'], packed['wih2'], packed['whh_bd'], packed['wtag'],
        packed['smalls'], packed['trans'], start_ix=tag_to_ix['START'])
    feats_np, path_np, score_np = jax.device_get((feats, path, score))   # one host fetch
    best_path = [int(v) for v in path_np[0]]
    return float(score_np[0, 0]), best_path, feats_np


# ----------------------------------------------------------------------------
# Parameter init (raw, PyTorch layout) + packing into the fused kernel layout
# ----------------------------------------------------------------------------
def init_params(key, vocab, E, hidden_dim, tag_to_ix):
    H = hidden_dim // 2
    NT = len(tag_to_ix)
    ks = jax.random.split(key, 14)
    f32 = jnp.float32

    def rn(k, shape, scale=0.1):
        return (scale * jax.random.normal(k, shape)).astype(f32)

    embed = jax.random.normal(ks[0], (vocab, E)).astype(f32)
    w_ih_f = rn(ks[1], (4 * H, E)); w_hh_f = rn(ks[2], (4 * H, H))
    b_ih_f = rn(ks[3], (4 * H,));   b_hh_f = rn(ks[4], (4 * H,))
    w_ih_b = rn(ks[5], (4 * H, E)); w_hh_b = rn(ks[6], (4 * H, H))
    b_ih_b = rn(ks[7], (4 * H,));   b_hh_b = rn(ks[8], (4 * H,))
    w_tag = rn(ks[9], (NT, hidden_dim)); b_tag = rn(ks[10], (NT,))
    trans = jax.random.normal(ks[11], (NT, NT)).astype(f32)
    trans = trans.at[:, tag_to_ix['START']].set(-100000.0)
    trans = trans.at[tag_to_ix['STOP'], :].set(-100000.0)
    h0 = jax.random.normal(ks[12], (2, 1, H)).astype(f32)   # init_hidden()
    c0 = jax.random.normal(ks[13], (2, 1, H)).astype(f32)
    return dict(embed=embed,
                w_ih_f=w_ih_f, w_hh_f=w_hh_f, b_ih_f=b_ih_f, b_hh_f=b_hh_f,
                w_ih_b=w_ih_b, w_hh_b=w_hh_b, b_ih_b=b_ih_b, b_hh_b=b_hh_b,
                w_tag=w_tag, b_tag=b_tag, trans=trans, h0=h0, c0=c0)


def pack_params(p, stop_ix):
    """Rearrange raw (PyTorch-layout) params into the fused kernel layout."""
    H = p['w_hh_f'].shape[1]
    NT = p['trans'].shape[0]
    W = 8 * H
    assert W >= 2 * NT and W >= 2 * H

    def fuse_gate_cols(a, b):
        # a, b: (X, 4H) per-direction gate-major [i|f|g|o] ->
        # (X, 8H) fused layout [i_f,i_b, f_f,f_b, g_f,g_b, o_f,o_b]
        blocks = []
        for k in range(4):
            blocks.append(a[:, k * H:(k + 1) * H])
            blocks.append(b[:, k * H:(k + 1) * H])
        return jnp.concatenate(blocks, axis=1)

    # input projection, zero-padded per direction: (E, 16H) = [fwd-contrib 8H | bwd-contrib 8H]
    wihT_f = p['w_ih_f'].T
    wihT_b = p['w_ih_b'].T
    z_e = jnp.zeros_like(wihT_f)
    wih2 = jnp.concatenate([fuse_gate_cols(wihT_f, z_e),
                            fuse_gate_cols(z_e, wihT_b)], axis=1)

    # block-diagonal recurrent weight (2H, 8H)
    whhT_f = p['w_hh_f'].T
    whhT_b = p['w_hh_b'].T
    z_h = jnp.zeros((H, 4 * H), jnp.float32)
    whh_bd = jnp.concatenate([fuse_gate_cols(whhT_f, z_h),
                              fuse_gate_cols(z_h, whhT_b)], axis=0)

    # fused bias row (1, 8H)
    b_f = (p['b_ih_f'] + p['b_hh_f']).reshape(1, 4 * H)
    b_b = (p['b_ih_b'] + p['b_hh_b']).reshape(1, 4 * H)
    b_fused = fuse_gate_cols(b_f, b_b)

    # hidden2tag weight (2H, NT): rows 0..H-1 forward, H..2H-1 backward
    wtag = jnp.concatenate([p['w_tag'][:, :H].T, p['w_tag'][:, H:].T], axis=0)

    def pad_row(row):
        return jnp.pad(row, ((0, 0), (0, W - row.shape[1])))

    h_row = pad_row(jnp.concatenate([p['h0'][0], p['h0'][1]], axis=1))
    c_row = pad_row(jnp.concatenate([p['c0'][0], p['c0'][1]], axis=1))
    tag_row = pad_row(jnp.concatenate([p['b_tag'].reshape(1, NT),
                                       p['trans'][:, stop_ix].reshape(1, NT)], axis=1))
    smalls = jnp.concatenate([b_fused, h_row, c_row, tag_row], axis=0)   # (4, 8H)

    return dict(embed=p['embed'], wih2=wih2, whh_bd=whh_bd, wtag=wtag,
                smalls=smalls, trans=p['trans'])


# ----------------------------------------------------------------------------
# Pure numpy references (correctness check)
# ----------------------------------------------------------------------------
def ref_lstm_feats(sentence, p):
    x = np.asarray(p['embed'])[np.asarray(sentence)].astype(np.float32)
    T = x.shape[0]
    H = np.asarray(p['w_hh_f']).shape[1]

    def sigmoid(z):
        return 1.0 / (1.0 + np.exp(-z))

    def run(w_ih, w_hh, b, h, c, order):
        w_ih = np.asarray(w_ih); w_hh = np.asarray(w_hh); b = np.asarray(b)
        h = np.asarray(h).copy(); c = np.asarray(c).copy()
        outs = {}
        for t in order:
            gates = x[t:t + 1] @ w_ih.T + h @ w_hh.T + b
            i = sigmoid(gates[:, 0:H]); f = sigmoid(gates[:, H:2 * H])
            g = np.tanh(gates[:, 2 * H:3 * H]); o = sigmoid(gates[:, 3 * H:4 * H])
            c = f * c + i * g
            h = o * np.tanh(c)
            outs[t] = h
        return outs

    bf = np.asarray(p['b_ih_f']) + np.asarray(p['b_hh_f'])
    bb = np.asarray(p['b_ih_b']) + np.asarray(p['b_hh_b'])
    hf = run(p['w_ih_f'], p['w_hh_f'], bf, p['h0'][0], p['c0'][0], range(T))
    hb = run(p['w_ih_b'], p['w_hh_b'], bb, p['h0'][1], p['c0'][1], range(T - 1, -1, -1))
    hcat = np.concatenate([np.concatenate([hf[t], hb[t]], axis=1) for t in range(T)], axis=0)
    return hcat @ np.asarray(p['w_tag']).T + np.asarray(p['b_tag'])


def ref_viterbi(feats, trans, start_ix, stop_ix):
    feats = np.asarray(feats, np.float32)
    trans = np.asarray(trans, np.float32)
    T, NT = feats.shape
    fv = np.full((NT,), -10000.0, np.float32)
    fv[start_ix] = 0.0
    bps = []
    for t in range(T):
        nv = fv[:, None] + trans
        bps.append(np.argmax(nv, axis=0))
        fv = (np.max(nv, axis=0) + feats[t]).astype(np.float32)
    term = fv + trans[:, stop_ix]
    best = int(np.argmax(term))
    score = float(term[best])
    path = [best]
    for bp in reversed(bps):
        best = int(bp[best])
        path.append(best)
    path.pop()          # drop START
    path.reverse()
    return score, path


if __name__ == "__main__":
    tag_to_ix = {'B': 0, 'I': 1, 'O': 2, 'START': 3, 'STOP': 4}
    vocab_size, embedding_dim, hidden_dim, T = 20, 32, 32, 8

    key = jax.random.PRNGKey(0)
    kp, ks = jax.random.split(key)
    raw = init_params(kp, vocab_size, embedding_dim, hidden_dim, tag_to_ix)
    packed = pack_params(raw, tag_to_ix['STOP'])
    sentence = jax.random.randint(ks, (T,), 0, vocab_size, dtype=jnp.int32)

    score, path, feats = bilstm_crf_forward(sentence, packed, tag_to_ix)
    jax.block_until_ready(packed['trans'])

    # verify emissions against a pure numpy reference (loose tol: default MXU precision)
    ref_feats = ref_lstm_feats(sentence, raw)
    np.testing.assert_allclose(np.asarray(feats), ref_feats, rtol=2e-2, atol=2e-2)

    # verify the Viterbi decode (reference run on the kernel's own feats so the comparison
    # is exact and only tests the Viterbi forward / backpointer / backtrace logic)
    ref_score, ref_path = ref_viterbi(np.asarray(feats), np.asarray(raw['trans']),
                                      tag_to_ix['START'], tag_to_ix['STOP'])
    assert path == ref_path, (path, ref_path)
    assert abs(score - ref_score) < 1e-2, (score, ref_score)

    print("KERNEL_OK")
</pallas_src>

<mosaic_0001>
module attributes {stable_mosaic.version = 11 : i64} {
  func.func @kernel(%arg0: memref<8x32xf32, #tpu.memory_space<vmem>>, %arg1: memref<32x256xf32, #tpu.memory_space<vmem>>, %arg2: memref<32x128xf32, #tpu.memory_space<vmem>>, %arg3: memref<32x5xf32, #tpu.memory_space<vmem>>, %arg4: memref<4x128xf32, #tpu.memory_space<vmem>>, %arg5: memref<5x5xf32, #tpu.memory_space<vmem>>, %arg6: memref<8x5xf32, #tpu.memory_space<vmem>>, %arg7: memref<1x8xi32, #tpu.memory_space<vmem>>, %arg8: memref<1x1xf32, #tpu.memory_space<vmem>>, %arg9: memref<8x16xf32, #tpu.memory_space<vmem>>, %arg10: memref<8x16xf32, #tpu.memory_space<vmem>>, %arg11: memref<8x5xf32, #tpu.memory_space<vmem>>) attributes {dimension_semantics = [], scalar_prefetch = 0 : i64, scratch_operands = 3 : i64, tpu.core_type = #tpu.core_type<tc>} {
    %c0 = arith.constant 0 : index
    %c0_0 = arith.constant 0 : index
    %0 = vector.load %arg0[%c0, %c0_0] : memref<8x32xf32, #tpu.memory_space<vmem>>, vector<8x32xf32>
    %c0_1 = arith.constant 0 : index
    %c0_2 = arith.constant 0 : index
    %1 = vector.load %arg1[%c0_1, %c0_2] : memref<32x256xf32, #tpu.memory_space<vmem>>, vector<32x256xf32>
    %cst = arith.constant dense<0.000000e+00> : vector<8x256xf32>
    %2 = tpu.matmul %0, %1, %cst {dimension_numbers = #tpu.dot_dimension_numbers<[1], [0], [0], [1], [0, 0, 1, 1], [], []>} : vector<8x32xf32>, vector<32x256xf32>, vector<8x256xf32> -> vector<8x256xf32>
    %3 = vector.extract_strided_slice %2 {offsets = [0, 0], sizes = [8, 128], strides = [1, 1]} : vector<8x256xf32> to vector<8x128xf32>
    %c0_3 = arith.constant 0 : index
    %c0_4 = arith.constant 0 : index
    %4 = vector.load %arg4[%c0_3, %c0_4] : memref<4x128xf32, #tpu.memory_space<vmem>>, vector<1x128xf32>
    %5 = vector.broadcast %4 : vector<1x128xf32> to vector<8x128xf32>
    %6 = arith.addf %3, %5 : vector<8x128xf32>
    %7 = vector.extract_strided_slice %2 {offsets = [0, 128], sizes = [8, 128], strides = [1, 1]} : vector<8x256xf32> to vector<8x128xf32>
    %c0_5 = arith.constant 0 : index
    %c0_6 = arith.constant 0 : index
    %8 = vector.load %arg2[%c0_5, %c0_6] : memref<32x128xf32, #tpu.memory_space<vmem>>, vector<32x128xf32>
    %c1 = arith.constant 1 : index
    %c0_7 = arith.constant 0 : index
    %9 = vector.load %arg4[%c1, %c0_7] : memref<4x128xf32, #tpu.memory_space<vmem>>, vector<1x32xf32>
    %c2 = arith.constant 2 : index
    %c0_8 = arith.constant 0 : index
    %10 = vector.load %arg4[%c2, %c0_8] : memref<4x128xf32, #tpu.memory_space<vmem>>, vector<1x32xf32>
    %11 = vector.extract_strided_slice %6 {offsets = [0, 0], sizes = [1, 128], strides = [1, 1]} : vector<8x128xf32> to vector<1x128xf32>
    %12 = vector.extract_strided_slice %7 {offsets = [7, 0], sizes = [1, 128], strides = [1, 1]} : vector<8x128xf32> to vector<1x128xf32>
    %13 = arith.addf %11, %12 : vector<1x128xf32>
    %cst_9 = arith.constant dense<0.000000e+00> : vector<1x128xf32>
    %14 = tpu.matmul %9, %8, %cst_9 {dimension_numbers = #tpu.dot_dimension_numbers<[1], [0], [0], [1], [0, 0, 1, 1], [], []>} : vector<1x32xf32>, vector<32x128xf32>, vector<1x128xf32> -> vector<1x128xf32>
    %15 = arith.addf %13, %14 : vector<1x128xf32>
    %16 = arith.negf %15 : vector<1x128xf32>
    %17 = math.exp %16 : vector<1x128xf32>
    %cst_10 = arith.constant 1.000000e+00 : f32
    %18 = vector.broadcast %cst_10 : f32 to vector<1x128xf32>
    %19 = arith.addf %18, %17 : vector<1x128xf32>
    %20 = arith.divf %18, %19 : vector<1x128xf32>
    %21 = vector.extract_strided_slice %20 {offsets = [0, 0], sizes = [1, 32], strides = [1, 1]} : vector<1x128xf32> to vector<1x32xf32>
    %22 = vector.extract_strided_slice %20 {offsets = [0, 32], sizes = [1, 32], strides = [1, 1]} : vector<1x128xf32> to vector<1x32xf32>
    %23 = vector.extract_strided_slice %20 {offsets = [0, 96], sizes = [1, 32], strides = [1, 1]} : vector<1x128xf32> to vector<1x32xf32>
    %24 = vector.extract_strided_slice %15 {offsets = [0, 64], sizes = [1, 32], strides = [1, 1]} : vector<1x128xf32> to vector<1x32xf32>
    %25 = math.tanh %24 : vector<1x32xf32>
    %26 = arith.mulf %22, %10 : vector<1x32xf32>
    %27 = arith.mulf %21, %25 : vector<1x32xf32>
    %28 = arith.addf %26, %27 : vector<1x32xf32>
    %29 = math.tanh %28 : vector<1x32xf32>
    %30 = arith.mulf %23, %29 : vector<1x32xf32>
    %31 = vector.extract_strided_slice %30 {offsets = [0, 0], sizes = [1, 16], strides = [1, 1]} : vector<1x32xf32> to vector<1x16xf32>
    %c0_11 = arith.constant 0 : index
    %c0_12 = arith.constant 0 : index
    %32 = vector.load %arg9[%c0_11, %c0_12] : memref<8x16xf32, #tpu.memory_space<vmem>>, vector<1x16xf32>
    tpu.vector_store %arg9[%c0_11, %c0_12], %31 {strides = array<i32>} : memref<8x16xf32, #tpu.memory_space<vmem>>, vector<1x16xf32>,
    %33 = vector.extract_strided_slice %30 {offsets = [0, 16], sizes = [1, 16], strides = [1, 1]} : vector<1x32xf32> to vector<1x16xf32>
    %c7 = arith.constant 7 : index
    %c0_13 = arith.constant 0 : index
    %34 = vector.load %arg10[%c7, %c0_13] : memref<8x16xf32, #tpu.memory_space<vmem>>, vector<1x16xf32>
    tpu.vector_store %arg10[%c7, %c0_13], %33 {strides = array<i32>} : memref<8x16xf32, #tpu.memory_space<vmem>>, vector<1x16xf32>,
    %35 = vector.extract_strided_slice %6 {offsets = [1, 0], sizes = [1, 128], strides = [1, 1]} : vector<8x128xf32> to vector<1x128xf32>
    %36 = vector.extract_strided_slice %7 {offsets = [6, 0], sizes = [1, 128], strides = [1, 1]} : vector<8x128xf32> to vector<1x128xf32>
    %37 = arith.addf %35, %36 : vector<1x128xf32>
    %cst_14 = arith.constant dense<0.000000e+00> : vector<1x128xf32>
    %38 = tpu.matmul %30, %8, %cst_14 {dimension_numbers = #tpu.dot_dimension_numbers<[1], [0], [0], [1], [0, 0, 1, 1], [], []>} : vector<1x32xf32>, vector<32x128xf32>, vector<1x128xf32> -> vector<1x128xf32>
    %39 = arith.addf %37, %38 : vector<1x128xf32>
    %40 = arith.negf %39 : vector<1x128xf32>
    %41 = math.exp %40 : vector<1x128xf32>
    %cst_15 = arith.constant 1.000000e+00 : f32
    %42 = vector.broadcast %cst_15 : f32 to vector<1x128xf32>
    %43 = arith.addf %42, %41 : vector<1x128xf32>
    %44 = arith.divf %42, %43 : vector<1x128xf32>
    %45 = vector.extract_strided_slice %44 {offsets = [0, 0], sizes = [1, 32], strides = [1, 1]} : vector<1x128xf32> to vector<1x32xf32>
    %46 = vector.extract_strided_slice %44 {offsets = [0, 32], sizes = [1, 32], strides = [1, 1]} : vector<1x128xf32> to vector<1x32xf32>
    %47 = vector.extract_strided_slice %44 {offsets = [0, 96], sizes = [1, 32], strides = [1, 1]} : vector<1x128xf32> to vector<1x32xf32>
    %48 = vector.extract_strided_slice %39 {offsets = [0, 64], sizes = [1, 32], strides = [1, 1]} : vector<1x128xf32> to vector<1x32xf32>
    %49 = math.tanh %48 : vector<1x32xf32>
    %50 = arith.mulf %46, %28 : vector<1x32xf32>
    %51 = arith.mulf %45, %49 : vector<1x32xf32>
    %52 = arith.addf %50, %51 : vector<1x32xf32>
    %53 = math.tanh %52 : vector<1x32xf32>
    %54 = arith.mulf %47, %53 : vector<1x32xf32>
    %55 = vector.extract_strided_slice %54 {offsets = [0, 0], sizes = [1, 16], strides = [1, 1]} : vector<1x32xf32> to vector<1x16xf32>
    %c1_16 = arith.constant 1 : index
    %c0_17 = arith.constant 0 : index
    %56 = vector.load %arg9[%c1_16, %c0_17] : memref<8x16xf32, #tpu.memory_space<vmem>>, vector<1x16xf32>
    tpu.vector_store %arg9[%c1_16, %c0_17], %55 {strides = array<i32>} : memref<8x16xf32, #tpu.memory_space<vmem>>, vector<1x16xf32>,
    %57 = vector.extract_strided_slice %54 {offsets = [0, 16], sizes = [1, 16], strides = [1, 1]} : vector<1x32xf32> to vector<1x16xf32>
    %c6 = arith.constant 6 : index
    %c0_18 = arith.constant 0 : index
    %58 = vector.load %arg10[%c6, %c0_18] : memref<8x16xf32, #tpu.memory_space<vmem>>, vector<1x16xf32>
    tpu.vector_store %arg10[%c6, %c0_18], %57 {strides = array<i32>} : memref<8x16xf32, #tpu.memory_space<vmem>>, vector<1x16xf32>,
    %59 = vector.extract_strided_slice %6 {offsets = [2, 0], sizes = [1, 128], strides = [1, 1]} : vector<8x128xf32> to vector<1x128xf32>
    %60 = vector.extract_strided_slice %7 {offsets = [5, 0], sizes = [1, 128], strides = [1, 1]} : vector<8x128xf32> to vector<1x128xf32>
    %61 = arith.addf %59, %60 : vector<1x128xf32>
    %cst_19 = arith.constant dense<0.000000e+00> : vector<1x128xf32>
    %62 = tpu.matmul %54, %8, %cst_19 {dimension_numbers = #tpu.dot_dimension_numbers<[1], [0], [0], [1], [0, 0, 1, 1], [], []>} : vector<1x32xf32>, vector<32x128xf32>, vector<1x128xf32> -> vector<1x128xf32>
    %63 = arith.addf %61, %62 : vector<1x128xf32>
    %64 = arith.negf %63 : vector<1x128xf32>
    %65 = math.exp %64 : vector<1x128xf32>
    %cst_20 = arith.constant 1.000000e+00 : f32
    %66 = vector.broadcast %cst_20 : f32 to vector<1x128xf32>
    %67 = arith.addf %66, %65 : vector<1x128xf32>
    %68 = arith.divf %66, %67 : vector<1x128xf32>
    %69 = vector.extract_strided_slice %68 {offsets = [0, 0], sizes = [1, 32], strides = [1, 1]} : vector<1x128xf32> to vector<1x32xf32>
    %70 = vector.extract_strided_slice %68 {offsets = [0, 32], sizes = [1, 32], strides = [1, 1]} : vector<1x128xf32> to vector<1x32xf32>
    %71 = vector.extract_strided_slice %68 {offsets = [0, 96], sizes = [1, 32], strides = [1, 1]} : vector<1x128xf32> to vector<1x32xf32>
    %72 = vector.extract_strided_slice %63 {offsets = [0, 64], sizes = [1, 32], strides = [1, 1]} : vector<1x128xf32> to vector<1x32xf32>
    %73 = math.tanh %72 : vector<1x32xf32>
    %74 = arith.mulf %70, %52 : vector<1x32xf32>
    %75 = arith.mulf %69, %73 : vector<1x32xf32>
    %76 = arith.addf %74, %75 : vector<1x32xf32>
    %77 = math.tanh %76 : vector<1x32xf32>
    %78 = arith.mulf %71, %77 : vector<1x32xf32>
    %79 = vector.extract_strided_slice %78 {offsets = [0, 0], sizes = [1, 16], strides = [1, 1]} : vector<1x32xf32> to vector<1x16xf32>
    %c2_21 = arith.constant 2 : index
    %c0_22 = arith.constant 0 : index
    %80 = vector.load %arg9[%c2_21, %c0_22] : memref<8x16xf32, #tpu.memory_space<vmem>>, vector<1x16xf32>
    tpu.vector_store %arg9[%c2_21, %c0_22], %79 {strides = array<i32>} : memref<8x16xf32, #tpu.memory_space<vmem>>, vector<1x16xf32>,
    %81 = vector.extract_strided_slice %78 {offsets = [0, 16], sizes = [1, 16], strides = [1, 1]} : vector<1x32xf32> to vector<1x16xf32>
    %c5 = arith.constant 5 : index
    %c0_23 = arith.constant 0 : index
    %82 = vector.load %arg10[%c5, %c0_23] : memref<8x16xf32, #tpu.memory_space<vmem>>, vector<1x16xf32>
    tpu.vector_store %arg10[%c5, %c0_23], %81 {strides = array<i32>} : memref<8x16xf32, #tpu.memory_space<vmem>>, vector<1x16xf32>,
    %83 = vector.extract_strided_slice %6 {offsets = [3, 0], sizes = [1, 128], strides = [1, 1]} : vector<8x128xf32> to vector<1x128xf32>
    %84 = vector.extract_strided_slice %7 {offsets = [4, 0], sizes = [1, 128], strides = [1, 1]} : vector<8x128xf32> to vector<1x128xf32>
    %85 = arith.addf %83, %84 : vector<1x128xf32>
    %cst_24 = arith.constant dense<0.000000e+00> : vector<1x128xf32>
    %86 = tpu.matmul %78, %8, %cst_24 {dimension_numbers = #tpu.dot_dimension_numbers<[1], [0], [0], [1], [0, 0, 1, 1], [], []>} : vector<1x32xf32>, vector<32x128xf32>, vector<1x128xf32> -> vector<1x128xf32>
    %87 = arith.addf %85, %86 : vector<1x128xf32>
    %88 = arith.negf %87 : vector<1x128xf32>
    %89 = math.exp %88 : vector<1x128xf32>
    %cst_25 = arith.constant 1.000000e+00 : f32
    %90 = vector.broadcast %cst_25 : f32 to vector<1x128xf32>
    %91 = arith.addf %90, %89 : vector<1x128xf32>
    %92 = arith.divf %90, %91 : vector<1x128xf32>
    %93 = vector.extract_strided_slice %92 {offsets = [0, 0], sizes = [1, 32], strides = [1, 1]} : vector<1x128xf32> to vector<1x32xf32>
    %94 = vector.extract_strided_slice %92 {offsets = [0, 32], sizes = [1, 32], strides = [1, 1]} : vector<1x128xf32> to vector<1x32xf32>
    %95 = vector.extract_strided_slice %92 {offsets = [0, 96], sizes = [1, 32], strides = [1, 1]} : vector<1x128xf32> to vector<1x32xf32>
    %96 = vector.extract_strided_slice %87 {offsets = [0, 64], sizes = [1, 32], strides = [1, 1]} : vector<1x128xf32> to vector<1x32xf32>
    %97 = math.tanh %96 : vector<1x32xf32>
    %98 = arith.mulf %94, %76 : vector<1x32xf32>
    %99 = arith.mulf %93, %97 : vector<1x32xf32>
    %100 = arith.addf %98, %99 : vector<1x32xf32>
    %101 = math.tanh %100 : vector<1x32xf32>
    %102 = arith.mulf %95, %101 : vector<1x32xf32>
    %103 = vector.extract_strided_slice %102 {offsets = [0, 0], sizes = [1, 16], strides = [1, 1]} : vector<1x32xf32> to vector<1x16xf32>
    %c3 = arith.constant 3 : index
    %c0_26 = arith.constant 0 : index
    %104 = vector.load %arg9[%c3, %c0_26] : memref<8x16xf32, #tpu.memory_space<vmem>>, vector<1x16xf32>
    tpu.vector_store %arg9[%c3, %c0_26], %103 {strides = array<i32>} : memref<8x16xf32, #tpu.memory_space<vmem>>, vector<1x16xf32>,
    %105 = vector.extract_strided_slice %102 {offsets = [0, 16], sizes = [1, 16], strides = [1, 1]} : vector<1x32xf32> to vector<1x16xf32>
    %c4 = arith.constant 4 : index
    %c0_27 = arith.constant 0 : index
    %106 = vector.load %arg10[%c4, %c0_27] : memref<8x16xf32, #tpu.memory_space<vmem>>, vector<1x16xf32>
    tpu.vector_store %arg10[%c4, %c0_27], %105 {strides = array<i32>} : memref<8x16xf32, #tpu.memory_space<vmem>>, vector<1x16xf32>,
    %107 = vector.extract_strided_slice %6 {offsets = [4, 0], sizes = [1, 128], strides = [1, 1]} : vector<8x128xf32> to vector<1x128xf32>
    %108 = vector.extract_strided_slice %7 {offsets = [3, 0], sizes = [1, 128], strides = [1, 1]} : vector<8x128xf32> to vector<1x128xf32>
    %109 = arith.addf %107, %108 : vector<1x128xf32>
    %cst_28 = arith.constant dense<0.000000e+00> : vector<1x128xf32>
    %110 = tpu.matmul %102, %8, %cst_28 {dimension_numbers = #tpu.dot_dimension_numbers<[1], [0], [0], [1], [0, 0, 1, 1], [], []>} : vector<1x32xf32>, vector<32x128xf32>, vector<1x128xf32> -> vector<1x128xf32>
    %111 = arith.addf %109, %110 : vector<1x128xf32>
    %112 = arith.negf %111 : vector<1x128xf32>
    %113 = math.exp %112 : vector<1x128xf32>
    %cst_29 = arith.constant 1.000000e+00 : f32
    %114 = vector.broadcast %cst_29 : f32 to vector<1x128xf32>
    %115 = arith.addf %114, %113 : vector<1x128xf32>
    %116 = arith.divf %114, %115 : vector<1x128xf32>
    %117 = vector.extract_strided_slice %116 {offsets = [0, 0], sizes = [1, 32], strides = [1, 1]} : vector<1x128xf32> to vector<1x32xf32>
    %118 = vector.extract_strided_slice %116 {offsets = [0, 32], sizes = [1, 32], strides = [1, 1]} : vector<1x128xf32> to vector<1x32xf32>
    %119 = vector.extract_strided_slice %116 {offsets = [0, 96], sizes = [1, 32], strides = [1, 1]} : vector<1x128xf32> to vector<1x32xf32>
    %120 = vector.extract_strided_slice %111 {offsets = [0, 64], sizes = [1, 32], strides = [1, 1]} : vector<1x128xf32> to vector<1x32xf32>
    %121 = math.tanh %120 : vector<1x32xf32>
    %122 = arith.mulf %118, %100 : vector<1x32xf32>
    %123 = arith.mulf %117, %121 : vector<1x32xf32>
    %124 = arith.addf %122, %123 : vector<1x32xf32>
    %125 = math.tanh %124 : vector<1x32xf32>
    %126 = arith.mulf %119, %125 : vector<1x32xf32>
    %127 = vector.extract_strided_slice %126 {offsets = [0, 0], sizes = [1, 16], strides = [1, 1]} : vector<1x32xf32> to vector<1x16xf32>
    %c4_30 = arith.constant 4 : index
    %c0_31 = arith.constant 0 : index
    %128 = vector.load %arg9[%c4_30, %c0_31] : memref<8x16xf32, #tpu.memory_space<vmem>>, vector<1x16xf32>
    tpu.vector_store %arg9[%c4_30, %c0_31], %127 {strides = array<i32>} : memref<8x16xf32, #tpu.memory_space<vmem>>, vector<1x16xf32>,
    %129 = vector.extract_strided_slice %126 {offsets = [0, 16], sizes = [1, 16], strides = [1, 1]} : vector<1x32xf32> to vector<1x16xf32>
    %c3_32 = arith.constant 3 : index
    %c0_33 = arith.constant 0 : index
    %130 = vector.load %arg10[%c3_32, %c0_33] : memref<8x16xf32, #tpu.memory_space<vmem>>, vector<1x16xf32>
    tpu.vector_store %arg10[%c3_32, %c0_33], %129 {strides = array<i32>} : memref<8x16xf32, #tpu.memory_space<vmem>>, vector<1x16xf32>,
    %131 = vector.extract_strided_slice %6 {offsets = [5, 0], sizes = [1, 128], strides = [1, 1]} : vector<8x128xf32> to vector<1x128xf32>
    %132 = vector.extract_strided_slice %7 {offsets = [2, 0], sizes = [1, 128], strides = [1, 1]} : vector<8x128xf32> to vector<1x128xf32>
    %133 = arith.addf %131, %132 : vector<1x128xf32>
    %cst_34 = arith.constant dense<0.000000e+00> : vector<1x128xf32>
    %134 = tpu.matmul %126, %8, %cst_34 {dimension_numbers = #tpu.dot_dimension_numbers<[1], [0], [0], [1], [0, 0, 1, 1], [], []>} : vector<1x32xf32>, vector<32x128xf32>, vector<1x128xf32> -> vector<1x128xf32>
    %135 = arith.addf %133, %134 : vector<1x128xf32>
    %136 = arith.negf %135 : vector<1x128xf32>
    %137 = math.exp %136 : vector<1x128xf32>
    %cst_35 = arith.constant 1.000000e+00 : f32
    %138 = vector.broadcast %cst_35 : f32 to vector<1x128xf32>
    %139 = arith.addf %138, %137 : vector<1x128xf32>
    %140 = arith.divf %138, %139 : vector<1x128xf32>
    %141 = vector.extract_strided_slice %140 {offsets = [0, 0], sizes = [1, 32], strides = [1, 1]} : vector<1x128xf32> to vector<1x32xf32>
    %142 = vector.extract_strided_slice %140 {offsets = [0, 32], sizes = [1, 32], strides = [1, 1]} : vector<1x128xf32> to vector<1x32xf32>
    %143 = vector.extract_strided_slice %140 {offsets = [0, 96], sizes = [1, 32], strides = [1, 1]} : vector<1x128xf32> to vector<1x32xf32>
    %144 = vector.extract_strided_slice %135 {offsets = [0, 64], sizes = [1, 32], strides = [1, 1]} : vector<1x128xf32> to vector<1x32xf32>
    %145 = math.tanh %144 : vector<1x32xf32>
    %146 = arith.mulf %142, %124 : vector<1x32xf32>
    %147 = arith.mulf %141, %145 : vector<1x32xf32>
    %148 = arith.addf %146, %147 : vector<1x32xf32>
    %149 = math.tanh %148 : vector<1x32xf32>
    %150 = arith.mulf %143, %149 : vector<1x32xf32>
    %151 = vector.extract_strided_slice %150 {offsets = [0, 0], sizes = [1, 16], strides = [1, 1]} : vector<1x32xf32> to vector<1x16xf32>
    %c5_36 = arith.constant 5 : index
    %c0_37 = arith.constant 0 : index
    %152 = vector.load %arg9[%c5_36, %c0_37] : memref<8x16xf32, #tpu.memory_space<vmem>>, vector<1x16xf32>
    tpu.vector_store %arg9[%c5_36, %c0_37], %151 {strides = array<i32>} : memref<8x16xf32, #tpu.memory_space<vmem>>, vector<1x16xf32>,
    %153 = vector.extract_strided_slice %150 {offsets = [0, 16], sizes = [1, 16], strides = [1, 1]} : vector<1x32xf32> to vector<1x16xf32>
    %c2_38 = arith.constant 2 : index
    %c0_39 = arith.constant 0 : index
    %154 = vector.load %arg10[%c2_38, %c0_39] : memref<8x16xf32, #tpu.memory_space<vmem>>, vector<1x16xf32>
    tpu.vector_store %arg10[%c2_38, %c0_39], %153 {strides = array<i32>} : memref<8x16xf32, #tpu.memory_space<vmem>>, vector<1x16xf32>,
    %155 = vector.extract_strided_slice %6 {offsets = [6, 0], sizes = [1, 128], strides = [1, 1]} : vector<8x128xf32> to vector<1x128xf32>
    %156 = vector.extract_strided_slice %7 {offsets = [1, 0], sizes = [1, 128], strides = [1, 1]} : vector<8x128xf32> to vector<1x128xf32>
    %157 = arith.addf %155, %156 : vector<1x128xf32>
    %cst_40 = arith.constant dense<0.000000e+00> : vector<1x128xf32>
    %158 = tpu.matmul %150, %8, %cst_40 {dimension_numbers = #tpu.dot_dimension_numbers<[1], [0], [0], [1], [0, 0, 1, 1], [], []>} : vector<1x32xf32>, vector<32x128xf32>, vector<1x128xf32> -> vector<1x128xf32>
    %159 = arith.addf %157, %158 : vector<1x128xf32>
    %160 = arith.negf %159 : vector<1x128xf32>
    %161 = math.exp %160 : vector<1x128xf32>
    %cst_41 = arith.constant 1.000000e+00 : f32
    %162 = vector.broadcast %cst_41 : f32 to vector<1x128xf32>
    %163 = arith.addf %162, %161 : vector<1x128xf32>
    %164 = arith.divf %162, %163 : vector<1x128xf32>
    %165 = vector.extract_strided_slice %164 {offsets = [0, 0], sizes = [1, 32], strides = [1, 1]} : vector<1x128xf32> to vector<1x32xf32>
    %166 = vector.extract_strided_slice %164 {offsets = [0, 32], sizes = [1, 32], strides = [1, 1]} : vector<1x128xf32> to vector<1x32xf32>
    %167 = vector.extract_strided_slice %164 {offsets = [0, 96], sizes = [1, 32], strides = [1, 1]} : vector<1x128xf32> to vector<1x32xf32>
    %168 = vector.extract_strided_slice %159 {offsets = [0, 64], sizes = [1, 32], strides = [1, 1]} : vector<1x128xf32> to vector<1x32xf32>
    %169 = math.tanh %168 : vector<1x32xf32>
    %170 = arith.mulf %166, %148 : vector<1x32xf32>
    %171 = arith.mulf %165, %169 : vector<1x32xf32>
    %172 = arith.addf %170, %171 : vector<1x32xf32>
    %173 = math.tanh %172 : vector<1x32xf32>
    %174 = arith.mulf %167, %173 : vector<1x32xf32>
    %175 = vector.extract_strided_slice %174 {offsets = [0, 0], sizes = [1, 16], strides = [1, 1]} : vector<1x32xf32> to vector<1x16xf32>
    %c6_42 = arith.constant 6 : index
    %c0_43 = arith.constant 0 : index
    %176 = vector.load %arg9[%c6_42, %c0_43] : memref<8x16xf32, #tpu.memory_space<vmem>>, vector<1x16xf32>
    tpu.vector_store %arg9[%c6_42, %c0_43], %175 {strides = array<i32>} : memref<8x16xf32, #tpu.memory_space<vmem>>, vector<1x16xf32>,
    %177 = vector.extract_strided_slice %174 {offsets = [0, 16], sizes = [1, 16], strides = [1, 1]} : vector<1x32xf32> to vector<1x16xf32>
    %c1_44 = arith.constant 1 : index
    %c0_45 = arith.constant 0 : index
    %178 = vector.load %arg10[%c1_44, %c0_45] : memref<8x16xf32, #tpu.memory_space<vmem>>, vector<1x16xf32>
    tpu.vector_store %arg10[%c1_44, %c0_45], %177 {strides = array<i32>} : memref<8x16xf32, #tpu.memory_space<vmem>>, vector<1x16xf32>,
    %179 = vector.extract_strided_slice %6 {offsets = [7, 0], sizes = [1, 128], strides = [1, 1]} : vector<8x128xf32> to vector<1x128xf32>
    %180 = vector.extract_strided_slice %7 {offsets = [0, 0], sizes = [1, 128], strides = [1, 1]} : vector<8x128xf32> to vector<1x128xf32>
    %181 = arith.addf %179, %180 : vector<1x128xf32>
    %cst_46 = arith.constant dense<0.000000e+00> : vector<1x128xf32>
    %182 = tpu.matmul %174, %8, %cst_46 {dimension_numbers = #tpu.dot_dimension_numbers<[1], [0], [0], [1], [0, 0, 1, 1], [], []>} : vector<1x32xf32>, vector<32x128xf32>, vector<1x128xf32> -> vector<1x128xf32>
    %183 = arith.addf %181, %182 : vector<1x128xf32>
    %184 = arith.negf %183 : vector<1x128xf32>
    %185 = math.exp %184 : vector<1x128xf32>
    %cst_47 = arith.constant 1.000000e+00 : f32
    %186 = vector.broadcast %cst_47 : f32 to vector<1x128xf32>
    %187 = arith.addf %186, %185 : vector<1x128xf32>
    %188 = arith.divf %186, %187 : vector<1x128xf32>
    %189 = vector.extract_strided_slice %188 {offsets = [0, 0], sizes = [1, 32], strides = [1, 1]} : vector<1x128xf32> to vector<1x32xf32>
    %190 = vector.extract_strided_slice %188 {offsets = [0, 32], sizes = [1, 32], strides = [1, 1]} : vector<1x128xf32> to vector<1x32xf32>
    %191 = vector.extract_strided_slice %188 {offsets = [0, 96], sizes = [1, 32], strides = [1, 1]} : vector<1x128xf32> to vector<1x32xf32>
    %192 = vector.extract_strided_slice %183 {offsets = [0, 64], sizes = [1, 32], strides = [1, 1]} : vector<1x128xf32> to vector<1x32xf32>
    %193 = math.tanh %192 : vector<1x32xf32>
    %194 = arith.mulf %190, %172 : vector<1x32xf32>
    %195 = arith.mulf %189, %193 : vector<1x32xf32>
    %196 = arith.addf %194, %195 : vector<1x32xf32>
    %197 = math.tanh %196 : vector<1x32xf32>
    %198 = arith.mulf %191, %197 : vector<1x32xf32>
    %199 = vector.extract_strided_slice %198 {offsets = [0, 0], sizes = [1, 16], strides = [1, 1]} : vector<1x32xf32> to vector<1x16xf32>
    %c7_48 = arith.constant 7 : index
    %c0_49 = arith.constant 0 : index
    %200 = vector.load %arg9[%c7_48, %c0_49] : memref<8x16xf32, #tpu.memory_space<vmem>>, vector<1x16xf32>
    tpu.vector_store %arg9[%c7_48, %c0_49], %199 {strides = array<i32>} : memref<8x16xf32, #tpu.memory_space<vmem>>, vector<1x16xf32>,
    %201 = vector.extract_strided_slice %198 {offsets = [0, 16], sizes = [1, 16], strides = [1, 1]} : vector<1x32xf32> to vector<1x16xf32>
    %c0_50 = arith.constant 0 : index
    %c0_51 = arith.constant 0 : index
    %202 = vector.load %arg10[%c0_50, %c0_51] : memref<8x16xf32, #tpu.memory_space<vmem>>, vector<1x16xf32>
    tpu.vector_store %arg10[%c0_50, %c0_51], %201 {strides = array<i32>} : memref<8x16xf32, #tpu.memory_space<vmem>>, vector<1x16xf32>,
    %c0_52 = arith.constant 0 : index
    %c0_53 = arith.constant 0 : index
    %203 = vector.load %arg3[%c0_52, %c0_53] : memref<32x5xf32, #tpu.memory_space<vmem>>, vector<32x5xf32>
    %c0_54 = arith.constant 0 : index
    %c0_55 = arith.constant 0 : index
    %204 = vector.load %arg9[%c0_54, %c0_55] : memref<8x16xf32, #tpu.memory_space<vmem>>, vector<8x16xf32>
    %205 = vector.extract_strided_slice %203 {offsets = [0, 0], sizes = [16, 5], strides = [1, 1]} : vector<32x5xf32> to vector<16x5xf32>
    %cst_56 = arith.constant dense<0.000000e+00> : vector<8x5xf32>
    %206 = tpu.matmul %204, %205, %cst_56 {dimension_numbers = #tpu.dot_dimension_numbers<[1], [0], [0], [1], [0, 0, 1, 1], [], []>} : vector<8x16xf32>, vector<16x5xf32>, vector<8x5xf32> -> vector<8x5xf32>
    %c0_57 = arith.constant 0 : index
    %c0_58 = arith.constant 0 : index
    %207 = vector.load %arg10[%c0_57, %c0_58] : memref<8x16xf32, #tpu.memory_space<vmem>>, vector<8x16xf32>
    %208 = vector.extract_strided_slice %203 {offsets = [16, 0], sizes = [16, 5], strides = [1, 1]} : vector<32x5xf32> to vector<16x5xf32>
    %cst_59 = arith.constant dense<0.000000e+00> : vector<8x5xf32>
    %209 = tpu.matmul %207, %208, %cst_59 {dimension_numbers = #tpu.dot_dimension_numbers<[1], [0], [0], [1], [0, 0, 1, 1], [], []>} : vector<8x16xf32>, vector<16x5xf32>, vector<8x5xf32> -> vector<8x5xf32>
    %210 = arith.addf %206, %209 : vector<8x5xf32>
    %c3_60 = arith.constant 3 : index
    %c0_61 = arith.constant 0 : index
    %211 = vector.load %arg4[%c3_60, %c0_61] : memref<4x128xf32, #tpu.memory_space<vmem>>, vector<1x5xf32>
    %212 = vector.broadcast %211 : vector<1x5xf32> to vector<8x5xf32>
    %213 = arith.addf %210, %212 : vector<8x5xf32>
    %c0_62 = arith.constant 0 : index
    %c0_63 = arith.constant 0 : index
    %214 = vector.load %arg6[%c0_62, %c0_63] : memref<8x5xf32, #tpu.memory_space<vmem>>, vector<8x5xf32>
    tpu.vector_store %arg6[%c0_62, %c0_63], %213 {strides = array<i32>} : memref<8x5xf32, #tpu.memory_space<vmem>>, vector<8x5xf32>,
    %215 = tpu.iota {dimensions = array<i32: 1>} : vector<1x5xi32>
    %216 = arith.sitofp %215 : vector<1x5xi32> to vector<1x5xf32>
    %217 = tpu.iota {dimensions = array<i32: 0>} : vector<5x5xi32>
    %218 = arith.sitofp %217 : vector<5x5xi32> to vector<5x5xf32>
    %cst_64 = arith.constant 3.000000e+00 : f32
    %219 = vector.broadcast %cst_64 : f32 to vector<1x5xf32>
    %220 = arith.cmpf oeq, %216, %219 : vector<1x5xf32>
    %cst_65 = arith.constant 0.000000e+00 : f32
    %cst_66 = arith.constant -1.000000e+04 : f32
    %221 = vector.broadcast %cst_65 : f32 to vector<1x5xf32>
    %222 = vector.broadcast %cst_66 : f32 to vector<1x5xf32>
    %223 = arith.select %220, %221, %222 : vector<1x5xi1>, vector<1x5xf32>
    %c0_67 = arith.constant 0 : index
    %c0_68 = arith.constant 0 : index
    %224 = vector.load %arg5[%c0_67, %c0_68] : memref<5x5xf32, #tpu.memory_space<vmem>>, vector<5x5xf32>
    %225 = tpu.transpose %223, [1, 0] : vector<1x5xf32> -> vector<5x1xf32>
    %226 = vector.broadcast %225 : vector<5x1xf32> to vector<5x5xf32>
    %227 = arith.addf %226, %224 : vector<5x5xf32>
    %cst_69 = arith.constant dense<0xFF800000> : vector<5xf32>
    %228 = vector.multi_reduction <maximumf>, %227, %cst_69 [0] : vector<5x5xf32> to vector<5xf32>
    %229 = vector.shape_cast %228 : vector<5xf32> to vector<1x5xf32>
    %230 = vector.broadcast %229 : vector<1x5xf32> to vector<5x5xf32>
    %231 = arith.cmpf oeq, %227, %230 : vector<5x5xf32>
    %cst_70 = arith.constant 5.000000e+00 : f32
    %232 = vector.broadcast %cst_70 : f32 to vector<5x5xf32>
    %233 = arith.select %231, %218, %232 : vector<5x5xi1>, vector<5x5xf32>
    %cst_71 = arith.constant dense<0x7F800000> : vector<5xf32>
    %234 = vector.multi_reduction <minimumf>, %233, %cst_71 [0] : vector<5x5xf32> to vector<5xf32>
    %235 = vector.shape_cast %234 : vector<5xf32> to vector<1x5xf32>
    %c0_72 = arith.constant 0 : index
    %c0_73 = arith.constant 0 : index
    %236 = vector.load %arg11[%c0_72, %c0_73] : memref<8x5xf32, #tpu.memory_space<vmem>>, vector<1x5xf32>
    tpu.vector_store %arg11[%c0_72, %c0_73], %235 {strides = array<i32>} : memref<8x5xf32, #tpu.memory_space<vmem>>, vector<1x5xf32>,
    %237 = vector.extract_strided_slice %213 {offsets = [0, 0], sizes = [1, 5], strides = [1, 1]} : vector<8x5xf32> to vector<1x5xf32>
    %238 = arith.addf %229, %237 : vector<1x5xf32>
    %239 = tpu.transpose %238, [1, 0] : vector<1x5xf32> -> vector<5x1xf32>
    %240 = vector.broadcast %239 : vector<5x1xf32> to vector<5x5xf32>
    %241 = arith.addf %240, %224 : vector<5x5xf32>
    %cst_74 = arith.constant dense<0xFF800000> : vector<5xf32>
    %242 = vector.multi_reduction <maximumf>, %241, %cst_74 [0] : vector<5x5xf32> to vector<5xf32>
    %243 = vector.shape_cast %242 : vector<5xf32> to vector<1x5xf32>
    %244 = vector.broadcast %243 : vector<1x5xf32> to vector<5x5xf32>
    %245 = arith.cmpf oeq, %241, %244 : vector<5x5xf32>
    %cst_75 = arith.constant 5.000000e+00 : f32
    %246 = vector.broadcast %cst_75 : f32 to vector<5x5xf32>
    %247 = arith.select %245, %218, %246 : vector<5x5xi1>, vector<5x5xf32>
    %cst_76 = arith.constant dense<0x7F800000> : vector<5xf32>
    %248 = vector.multi_reduction <minimumf>, %247, %cst_76 [0] : vector<5x5xf32> to vector<5xf32>
    %249 = vector.shape_cast %248 : vector<5xf32> to vector<1x5xf32>
    %c1_77 = arith.constant 1 : index
    %c0_78 = arith.constant 0 : index
    %250 = vector.load %arg11[%c1_77, %c0_78] : memref<8x5xf32, #tpu.memory_space<vmem>>, vector<1x5xf32>
    tpu.vector_store %arg11[%c1_77, %c0_78], %249 {strides = array<i32>} : memref<8x5xf32, #tpu.memory_space<vmem>>, vector<1x5xf32>,
    %251 = vector.extract_strided_slice %213 {offsets = [1, 0], sizes = [1, 5], strides = [1, 1]} : vector<8x5xf32> to vector<1x5xf32>
    %252 = arith.addf %243, %251 : vector<1x5xf32>
    %253 = tpu.transpose %252, [1, 0] : vector<1x5xf32> -> vector<5x1xf32>
    %254 = vector.broadcast %253 : vector<5x1xf32> to vector<5x5xf32>
    %255 = arith.addf %254, %224 : vector<5x5xf32>
    %cst_79 = arith.constant dense<0xFF800000> : vector<5xf32>
    %256 = vector.multi_reduction <maximumf>, %255, %cst_79 [0] : vector<5x5xf32> to vector<5xf32>
    %257 = vector.shape_cast %256 : vector<5xf32> to vector<1x5xf32>
    %258 = vector.broadcast %257 : vector<1x5xf32> to vector<5x5xf32>
    %259 = arith.cmpf oeq, %255, %258 : vector<5x5xf32>
    %cst_80 = arith.constant 5.000000e+00 : f32
    %260 = vector.broadcast %cst_80 : f32 to vector<5x5xf32>
    %261 = arith.select %259, %218, %260 : vector<5x5xi1>, vector<5x5xf32>
    %cst_81 = arith.constant dense<0x7F800000> : vector<5xf32>
    %262 = vector.multi_reduction <minimumf>, %261, %cst_81 [0] : vector<5x5xf32> to vector<5xf32>
    %263 = vector.shape_cast %262 : vector<5xf32> to vector<1x5xf32>
    %c2_82 = arith.constant 2 : index
    %c0_83 = arith.constant 0 : index
    %264 = vector.load %arg11[%c2_82, %c0_83] : memref<8x5xf32, #tpu.memory_space<vmem>>, vector<1x5xf32>
    tpu.vector_store %arg11[%c2_82, %c0_83], %263 {strides = array<i32>} : memref<8x5xf32, #tpu.memory_space<vmem>>, vector<1x5xf32>,
    %265 = vector.extract_strided_slice %213 {offsets = [2, 0], sizes = [1, 5], strides = [1, 1]} : vector<8x5xf32> to vector<1x5xf32>
    %266 = arith.addf %257, %265 : vector<1x5xf32>
    %267 = tpu.transpose %266, [1, 0] : vector<1x5xf32> -> vector<5x1xf32>
    %268 = vector.broadcast %267 : vector<5x1xf32> to vector<5x5xf32>
    %269 = arith.addf %268, %224 : vector<5x5xf32>
    %cst_84 = arith.constant dense<0xFF800000> : vector<5xf32>
    %270 = vector.multi_reduction <maximumf>, %269, %cst_84 [0] : vector<5x5xf32> to vector<5xf32>
    %271 = vector.shape_cast %270 : vector<5xf32> to vector<1x5xf32>
    %272 = vector.broadcast %271 : vector<1x5xf32> to vector<5x5xf32>
    %273 = arith.cmpf oeq, %269, %272 : vector<5x5xf32>
    %cst_85 = arith.constant 5.000000e+00 : f32
    %274 = vector.broadcast %cst_85 : f32 to vector<5x5xf32>
    %275 = arith.select %273, %218, %274 : vector<5x5xi1>, vector<5x5xf32>
    %cst_86 = arith.constant dense<0x7F800000> : vector<5xf32>
    %276 = vector.multi_reduction <minimumf>, %275, %cst_86 [0] : vector<5x5xf32> to vector<5xf32>
    %277 = vector.shape_cast %276 : vector<5xf32> to vector<1x5xf32>
    %c3_87 = arith.constant 3 : index
    %c0_88 = arith.constant 0 : index
    %278 = vector.load %arg11[%c3_87, %c0_88] : memref<8x5xf32, #tpu.memory_space<vmem>>, vector<1x5xf32>
    tpu.vector_store %arg11[%c3_87, %c0_88], %277 {strides = array<i32>} : memref<8x5xf32, #tpu.memory_space<vmem>>, vector<1x5xf32>,
    %279 = vector.extract_strided_slice %213 {offsets = [3, 0], sizes = [1, 5], strides = [1, 1]} : vector<8x5xf32> to vector<1x5xf32>
    %280 = arith.addf %271, %279 : vector<1x5xf32>
    %281 = tpu.transpose %280, [1, 0] : vector<1x5xf32> -> vector<5x1xf32>
    %282 = vector.broadcast %281 : vector<5x1xf32> to vector<5x5xf32>
    %283 = arith.addf %282, %224 : vector<5x5xf32>
    %cst_89 = arith.constant dense<0xFF800000> : vector<5xf32>
    %284 = vector.multi_reduction <maximumf>, %283, %cst_89 [0] : vector<5x5xf32> to vector<5xf32>
    %285 = vector.shape_cast %284 : vector<5xf32> to vector<1x5xf32>
    %286 = vector.broadcast %285 : vector<1x5xf32> to vector<5x5xf32>
    %287 = arith.cmpf oeq, %283, %286 : vector<5x5xf32>
    %cst_90 = arith.constant 5.000000e+00 : f32
    %288 = vector.broadcast %cst_90 : f32 to vector<5x5xf32>
    %289 = arith.select %287, %218, %288 : vector<5x5xi1>, vector<5x5xf32>
    %cst_91 = arith.constant dense<0x7F800000> : vector<5xf32>
    %290 = vector.multi_reduction <minimumf>, %289, %cst_91 [0] : vector<5x5xf32> to vector<5xf32>
    %291 = vector.shape_cast %290 : vector<5xf32> to vector<1x5xf32>
    %c4_92 = arith.constant 4 : index
    %c0_93 = arith.constant 0 : index
    %292 = vector.load %arg11[%c4_92, %c0_93] : memref<8x5xf32, #tpu.memory_space<vmem>>, vector<1x5xf32>
    tpu.vector_store %arg11[%c4_92, %c0_93], %291 {strides = array<i32>} : memref<8x5xf32, #tpu.memory_space<vmem>>, vector<1x5xf32>,
    %293 = vector.extract_strided_slice %213 {offsets = [4, 0], sizes = [1, 5], strides = [1, 1]} : vector<8x5xf32> to vector<1x5xf32>
    %294 = arith.addf %285, %293 : vector<1x5xf32>
    %295 = tpu.transpose %294, [1, 0] : vector<1x5xf32> -> vector<5x1xf32>
    %296 = vector.broadcast %295 : vector<5x1xf32> to vector<5x5xf32>
    %297 = arith.addf %296, %224 : vector<5x5xf32>
    %cst_94 = arith.constant dense<0xFF800000> : vector<5xf32>
    %298 = vector.multi_reduction <maximumf>, %297, %cst_94 [0] : vector<5x5xf32> to vector<5xf32>
    %299 = vector.shape_cast %298 : vector<5xf32> to vector<1x5xf32>
    %300 = vector.broadcast %299 : vector<1x5xf32> to vector<5x5xf32>
    %301 = arith.cmpf oeq, %297, %300 : vector<5x5xf32>
    %cst_95 = arith.constant 5.000000e+00 : f32
    %302 = vector.broadcast %cst_95 : f32 to vector<5x5xf32>
    %303 = arith.select %301, %218, %302 : vector<5x5xi1>, vector<5x5xf32>
    %cst_96 = arith.constant dense<0x7F800000> : vector<5xf32>
    %304 = vector.multi_reduction <minimumf>, %303, %cst_96 [0] : vector<5x5xf32> to vector<5xf32>
    %305 = vector.shape_cast %304 : vector<5xf32> to vector<1x5xf32>
    %c5_97 = arith.constant 5 : index
    %c0_98 = arith.constant 0 : index
    %306 = vector.load %arg11[%c5_97, %c0_98] : memref<8x5xf32, #tpu.memory_space<vmem>>, vector<1x5xf32>
    tpu.vector_store %arg11[%c5_97, %c0_98], %305 {strides = array<i32>} : memref<8x5xf32, #tpu.memory_space<vmem>>, vector<1x5xf32>,
    %307 = vector.extract_strided_slice %213 {offsets = [5, 0], sizes = [1, 5], strides = [1, 1]} : vector<8x5xf32> to vector<1x5xf32>
    %308 = arith.addf %299, %307 : vector<1x5xf32>
    %309 = tpu.transpose %308, [1, 0] : vector<1x5xf32> -> vector<5x1xf32>
    %310 = vector.broadcast %309 : vector<5x1xf32> to vector<5x5xf32>
    %311 = arith.addf %310, %224 : vector<5x5xf32>
    %cst_99 = arith.constant dense<0xFF800000> : vector<5xf32>
    %312 = vector.multi_reduction <maximumf>, %311, %cst_99 [0] : vector<5x5xf32> to vector<5xf32>
    %313 = vector.shape_cast %312 : vector<5xf32> to vector<1x5xf32>
    %314 = vector.broadcast %313 : vector<1x5xf32> to vector<5x5xf32>
    %315 = arith.cmpf oeq, %311, %314 : vector<5x5xf32>
    %cst_100 = arith.constant 5.000000e+00 : f32
    %316 = vector.broadcast %cst_100 : f32 to vector<5x5xf32>
    %317 = arith.select %315, %218, %316 : vector<5x5xi1>, vector<5x5xf32>
    %cst_101 = arith.constant dense<0x7F800000> : vector<5xf32>
    %318 = vector.multi_reduction <minimumf>, %317, %cst_101 [0] : vector<5x5xf32> to vector<5xf32>
    %319 = vector.shape_cast %318 : vector<5xf32> to vector<1x5xf32>
    %c6_102 = arith.constant 6 : index
    %c0_103 = arith.constant 0 : index
    %320 = vector.load %arg11[%c6_102, %c0_103] : memref<8x5xf32, #tpu.memory_space<vmem>>, vector<1x5xf32>
    tpu.vector_store %arg11[%c6_102, %c0_103], %319 {strides = array<i32>} : memref<8x5xf32, #tpu.memory_space<vmem>>, vector<1x5xf32>,
    %321 = vector.extract_strided_slice %213 {offsets = [6, 0], sizes = [1, 5], strides = [1, 1]} : vector<8x5xf32> to vector<1x5xf32>
    %322 = arith.addf %313, %321 : vector<1x5xf32>
    %323 = tpu.transpose %322, [1, 0] : vector<1x5xf32> -> vector<5x1xf32>
    %324 = vector.broadcast %323 : vector<5x1xf32> to vector<5x5xf32>
    %325 = arith.addf %324, %224 : vector<5x5xf32>
    %cst_104 = arith.constant dense<0xFF800000> : vector<5xf32>
    %326 = vector.multi_reduction <maximumf>, %325, %cst_104 [0] : vector<5x5xf32> to vector<5xf32>
    %327 = vector.shape_cast %326 : vector<5xf32> to vector<1x5xf32>
    %328 = vector.broadcast %327 : vector<1x5xf32> to vector<5x5xf32>
    %329 = arith.cmpf oeq, %325, %328 : vector<5x5xf32>
    %cst_105 = arith.constant 5.000000e+00 : f32
    %330 = vector.broadcast %cst_105 : f32 to vector<5x5xf32>
    %331 = arith.select %329, %218, %330 : vector<5x5xi1>, vector<5x5xf32>
    %cst_106 = arith.constant dense<0x7F800000> : vector<5xf32>
    %332 = vector.multi_reduction <minimumf>, %331, %cst_106 [0] : vector<5x5xf32> to vector<5xf32>
    %333 = vector.shape_cast %332 : vector<5xf32> to vector<1x5xf32>
    %c7_107 = arith.constant 7 : index
    %c0_108 = arith.constant 0 : index
    %334 = vector.load %arg11[%c7_107, %c0_108] : memref<8x5xf32, #tpu.memory_space<vmem>>, vector<1x5xf32>
    tpu.vector_store %arg11[%c7_107, %c0_108], %333 {strides = array<i32>} : memref<8x5xf32, #tpu.memory_space<vmem>>, vector<1x5xf32>,
    %335 = vector.extract_strided_slice %213 {offsets = [7, 0], sizes = [1, 5], strides = [1, 1]} : vector<8x5xf32> to vector<1x5xf32>
    %336 = arith.addf %327, %335 : vector<1x5xf32>
    %c3_109 = arith.constant 3 : index
    %c5_110 = arith.constant 5 : index
    %337 = vector.load %arg4[%c3_109, %c5_110] : memref<4x128xf32, #tpu.memory_space<vmem>>, vector<1x5xf32>
    %338 = arith.addf %336, %337 : vector<1x5xf32>
    %cst_111 = arith.constant dense<0xFF800000> : vector<1xf32>
    %339 = vector.multi_reduction <maximumf>, %338, %cst_111 [1] : vector<1x5xf32> to vector<1xf32>
    %340 = vector.shape_cast %339 : vector<1xf32> to vector<1x1xf32>
    %341 = vector.broadcast %340 : vector<1x1xf32> to vector<1x5xf32>
    %342 = arith.cmpf oeq, %338, %341 : vector<1x5xf32>
    %cst_112 = arith.constant 5.000000e+00 : f32
    %343 = vector.broadcast %cst_112 : f32 to vector<1x5xf32>
    %344 = arith.select %342, %216, %343 : vector<1x5xi1>, vector<1x5xf32>
    %cst_113 = arith.constant dense<0x7F800000> : vector<1xf32>
    %345 = vector.multi_reduction <minimumf>, %344, %cst_113 [1] : vector<1x5xf32> to vector<1xf32>
    %346 = vector.shape_cast %345 : vector<1xf32> to vector<1x1xf32>
    %347 = vector.broadcast %346 : vector<1x1xf32> to vector<1x5xf32>
    %348 = arith.cmpf oeq, %216, %347 : vector<1x5xf32>
    %cst_114 = arith.constant 1.000000e+00 : f32
    %cst_115 = arith.constant 0.000000e+00 : f32
    %349 = vector.broadcast %cst_114 : f32 to vector<1x5xf32>
    %350 = vector.broadcast %cst_115 : f32 to vector<1x5xf32>
    %351 = arith.select %348, %349, %350 : vector<1x5xi1>, vector<1x5xf32>
    %c0_116 = arith.constant 0 : index
    %c0_117 = arith.constant 0 : index
    %352 = vector.load %arg8[%c0_116, %c0_117] : memref<1x1xf32, #tpu.memory_space<vmem>>, vector<1x1xf32>
    tpu.vector_store %arg8[%c0_116, %c0_117], %340 {strides = array<i32>} : memref<1x1xf32, #tpu.memory_space<vmem>>, vector<1x1xf32>,
    %353 = tpu.iota {dimensions = array<i32: 1>} : vector<1x8xi32>
    %354 = arith.sitofp %353 : vector<1x8xi32> to vector<1x8xf32>
    %cst_118 = arith.constant 7.000000e+00 : f32
    %355 = vector.broadcast %cst_118 : f32 to vector<1x8xf32>
    %356 = arith.cmpf oeq, %354, %355 : vector<1x8xf32>
    %cst_119 = arith.constant 0.000000e+00 : f32
    %357 = vector.shape_cast %346 : vector<1x1xf32> to vector<1x1xf32>
    %358 = vector.broadcast %357 : vector<1x1xf32> to vector<1x8xf32>
    %359 = vector.broadcast %cst_119 : f32 to vector<1x8xf32>
    %360 = arith.select %356, %358, %359 : vector<1x8xi1>, vector<1x8xf32>
    %c7_120 = arith.constant 7 : index
    %c0_121 = arith.constant 0 : index
    %361 = vector.load %arg11[%c7_120, %c0_121] : memref<8x5xf32, #tpu.memory_space<vmem>>, vector<1x5xf32>
    %cst_122 = arith.constant 5.000000e-01 : f32
    %362 = vector.broadcast %cst_122 : f32 to vector<1x5xf32>
    %363 = arith.cmpf ogt, %351, %362 : vector<1x5xf32>
    %cst_123 = arith.constant -1.000000e+00 : f32
    %364 = vector.broadcast %cst_123 : f32 to vector<1x5xf32>
    %365 = arith.select %363, %361, %364 : vector<1x5xi1>, vector<1x5xf32>
    %cst_124 = arith.constant dense<0xFF800000> : vector<1xf32>
    %366 = vector.multi_reduction <maximumf>, %365, %cst_124 [1] : vector<1x5xf32> to vector<1xf32>
    %367 = vector.shape_cast %366 : vector<1xf32> to vector<1x1xf32>
    %368 = vector.broadcast %367 : vector<1x1xf32> to vector<1x5xf32>
    %369 = arith.cmpf oeq, %216, %368 : vector<1x5xf32>
    %cst_125 = arith.constant 1.000000e+00 : f32
    %cst_126 = arith.constant 0.000000e+00 : f32
    %370 = vector.broadcast %cst_125 : f32 to vector<1x5xf32>
    %371 = vector.broadcast %cst_126 : f32 to vector<1x5xf32>
    %372 = arith.select %369, %370, %371 : vector<1x5xi1>, vector<1x5xf32>
    %cst_127 = arith.constant 6.000000e+00 : f32
    %373 = vector.broadcast %cst_127 : f32 to vector<1x8xf32>
    %374 = arith.cmpf oeq, %354, %373 : vector<1x8xf32>
    %375 = vector.shape_cast %367 : vector<1x1xf32> to vector<1x1xf32>
    %376 = vector.broadcast %375 : vector<1x1xf32> to vector<1x8xf32>
    %377 = arith.select %374, %376, %360 : vector<1x8xi1>, vector<1x8xf32>
    %c6_128 = arith.constant 6 : index
    %c0_129 = arith.constant 0 : index
    %378 = vector.load %arg11[%c6_128, %c0_129] : memref<8x5xf32, #tpu.memory_space<vmem>>, vector<1x5xf32>
    %cst_130 = arith.constant 5.000000e-01 : f32
    %379 = vector.broadcast %cst_130 : f32 to vector<1x5xf32>
    %380 = arith.cmpf ogt, %372, %379 : vector<1x5xf32>
    %cst_131 = arith.constant -1.000000e+00 : f32
    %381 = vector.broadcast %cst_131 : f32 to vector<1x5xf32>
    %382 = arith.select %380, %378, %381 : vector<1x5xi1>, vector<1x5xf32>
    %cst_132 = arith.constant dense<0xFF800000> : vector<1xf32>
    %383 = vector.multi_reduction <maximumf>, %382, %cst_132 [1] : vector<1x5xf32> to vector<1xf32>
    %384 = vector.shape_cast %383 : vector<1xf32> to vector<1x1xf32>
    %385 = vector.broadcast %384 : vector<1x1xf32> to vector<1x5xf32>
    %386 = arith.cmpf oeq, %216, %385 : vector<1x5xf32>
    %cst_133 = arith.constant 1.000000e+00 : f32
    %cst_134 = arith.constant 0.000000e+00 : f32
    %387 = vector.broadcast %cst_133 : f32 to vector<1x5xf32>
    %388 = vector.broadcast %cst_134 : f32 to vector<1x5xf32>
    %389 = arith.select %386, %387, %388 : vector<1x5xi1>, vector<1x5xf32>
    %cst_135 = arith.constant 5.000000e+00 : f32
    %390 = vector.broadcast %cst_135 : f32 to vector<1x8xf32>
    %391 = arith.cmpf oeq, %354, %390 : vector<1x8xf32>
    %392 = vector.shape_cast %384 : vector<1x1xf32> to vector<1x1xf32>
    %393 = vector.broadcast %392 : vector<1x1xf32> to vector<1x8xf32>
    %394 = arith.select %391, %393, %377 : vector<1x8xi1>, vector<1x8xf32>
    %c5_136 = arith.constant 5 : index
    %c0_137 = arith.constant 0 : index
    %395 = vector.load %arg11[%c5_136, %c0_137] : memref<8x5xf32, #tpu.memory_space<vmem>>, vector<1x5xf32>
    %cst_138 = arith.constant 5.000000e-01 : f32
    %396 = vector.broadcast %cst_138 : f32 to vector<1x5xf32>
    %397 = arith.cmpf ogt, %389, %396 : vector<1x5xf32>
    %cst_139 = arith.constant -1.000000e+00 : f32
    %398 = vector.broadcast %cst_139 : f32 to vector<1x5xf32>
    %399 = arith.select %397, %395, %398 : vector<1x5xi1>, vector<1x5xf32>
    %cst_140 = arith.constant dense<0xFF800000> : vector<1xf32>
    %400 = vector.multi_reduction <maximumf>, %399, %cst_140 [1] : vector<1x5xf32> to vector<1xf32>
    %401 = vector.shape_cast %400 : vector<1xf32> to vector<1x1xf32>
    %402 = vector.broadcast %401 : vector<1x1xf32> to vector<1x5xf32>
    %403 = arith.cmpf oeq, %216, %402 : vector<1x5xf32>
    %cst_141 = arith.constant 1.000000e+00 : f32
    %cst_142 = arith.constant 0.000000e+00 : f32
    %404 = vector.broadcast %cst_141 : f32 to vector<1x5xf32>
    %405 = vector.broadcast %cst_142 : f32 to vector<1x5xf32>
    %406 = arith.select %403, %404, %405 : vector<1x5xi1>, vector<1x5xf32>
    %cst_143 = arith.constant 4.000000e+00 : f32
    %407 = vector.broadcast %cst_143 : f32 to vector<1x8xf32>
    %408 = arith.cmpf oeq, %354, %407 : vector<1x8xf32>
    %409 = vector.shape_cast %401 : vector<1x1xf32> to vector<1x1xf32>
    %410 = vector.broadcast %409 : vector<1x1xf32> to vector<1x8xf32>
    %411 = arith.select %408, %410, %394 : vector<1x8xi1>, vector<1x8xf32>
    %c4_144 = arith.constant 4 : index
    %c0_145 = arith.constant 0 : index
    %412 = vector.load %arg11[%c4_144, %c0_145] : memref<8x5xf32, #tpu.memory_space<vmem>>, vector<1x5xf32>
    %cst_146 = arith.constant 5.000000e-01 : f32
    %413 = vector.broadcast %cst_146 : f32 to vector<1x5xf32>
    %414 = arith.cmpf ogt, %406, %413 : vector<1x5xf32>
    %cst_147 = arith.constant -1.000000e+00 : f32
    %415 = vector.broadcast %cst_147 : f32 to vector<1x5xf32>
    %416 = arith.select %414, %412, %415 : vector<1x5xi1>, vector<1x5xf32>
    %cst_148 = arith.constant dense<0xFF800000> : vector<1xf32>
    %417 = vector.multi_reduction <maximumf>, %416, %cst_148 [1] : vector<1x5xf32> to vector<1xf32>
    %418 = vector.shape_cast %417 : vector<1xf32> to vector<1x1xf32>
    %419 = vector.broadcast %418 : vector<1x1xf32> to vector<1x5xf32>
    %420 = arith.cmpf oeq, %216, %419 : vector<1x5xf32>
    %cst_149 = arith.constant 1.000000e+00 : f32
    %cst_150 = arith.constant 0.000000e+00 : f32
    %421 = vector.broadcast %cst_149 : f32 to vector<1x5xf32>
    %422 = vector.broadcast %cst_150 : f32 to vector<1x5xf32>
    %423 = arith.select %420, %421, %422 : vector<1x5xi1>, vector<1x5xf32>
    %cst_151 = arith.constant 3.000000e+00 : f32
    %424 = vector.broadcast %cst_151 : f32 to vector<1x8xf32>
    %425 = arith.cmpf oeq, %354, %424 : vector<1x8xf32>
    %426 = vector.shape_cast %418 : vector<1x1xf32> to vector<1x1xf32>
    %427 = vector.broadcast %426 : vector<1x1xf32> to vector<1x8xf32>
    %428 = arith.select %425, %427, %411 : vector<1x8xi1>, vector<1x8xf32>
    %c3_152 = arith.constant 3 : index
    %c0_153 = arith.constant 0 : index
    %429 = vector.load %arg11[%c3_152, %c0_153] : memref<8x5xf32, #tpu.memory_space<vmem>>, vector<1x5xf32>
    %cst_154 = arith.constant 5.000000e-01 : f32
    %430 = vector.broadcast %cst_154 : f32 to vector<1x5xf32>
    %431 = arith.cmpf ogt, %423, %430 : vector<1x5xf32>
    %cst_155 = arith.constant -1.000000e+00 : f32
    %432 = vector.broadcast %cst_155 : f32 to vector<1x5xf32>
    %433 = arith.select %431, %429, %432 : vector<1x5xi1>, vector<1x5xf32>
    %cst_156 = arith.constant dense<0xFF800000> : vector<1xf32>
    %434 = vector.multi_reduction <maximumf>, %433, %cst_156 [1] : vector<1x5xf32> to vector<1xf32>
    %435 = vector.shape_cast %434 : vector<1xf32> to vector<1x1xf32>
    %436 = vector.broadcast %435 : vector<1x1xf32> to vector<1x5xf32>
    %437 = arith.cmpf oeq, %216, %436 : vector<1x5xf32>
    %cst_157 = arith.constant 1.000000e+00 : f32
    %cst_158 = arith.constant 0.000000e+00 : f32
    %438 = vector.broadcast %cst_157 : f32 to vector<1x5xf32>
    %439 = vector.broadcast %cst_158 : f32 to vector<1x5xf32>
    %440 = arith.select %437, %438, %439 : vector<1x5xi1>, vector<1x5xf32>
    %cst_159 = arith.constant 2.000000e+00 : f32
    %441 = vector.broadcast %cst_159 : f32 to vector<1x8xf32>
    %442 = arith.cmpf oeq, %354, %441 : vector<1x8xf32>
    %443 = vector.shape_cast %435 : vector<1x1xf32> to vector<1x1xf32>
    %444 = vector.broadcast %443 : vector<1x1xf32> to vector<1x8xf32>
    %445 = arith.select %442, %444, %428 : vector<1x8xi1>, vector<1x8xf32>
    %c2_160 = arith.constant 2 : index
    %c0_161 = arith.constant 0 : index
    %446 = vector.load %arg11[%c2_160, %c0_161] : memref<8x5xf32, #tpu.memory_space<vmem>>, vector<1x5xf32>
    %cst_162 = arith.constant 5.000000e-01 : f32
    %447 = vector.broadcast %cst_162 : f32 to vector<1x5xf32>
    %448 = arith.cmpf ogt, %440, %447 : vector<1x5xf32>
    %cst_163 = arith.constant -1.000000e+00 : f32
    %449 = vector.broadcast %cst_163 : f32 to vector<1x5xf32>
    %450 = arith.select %448, %446, %449 : vector<1x5xi1>, vector<1x5xf32>
    %cst_164 = arith.constant dense<0xFF800000> : vector<1xf32>
    %451 = vector.multi_reduction <maximumf>, %450, %cst_164 [1] : vector<1x5xf32> to vector<1xf32>
    %452 = vector.shape_cast %451 : vector<1xf32> to vector<1x1xf32>
    %453 = vector.broadcast %452 : vector<1x1xf32> to vector<1x5xf32>
    %454 = arith.cmpf oeq, %216, %453 : vector<1x5xf32>
    %cst_165 = arith.constant 1.000000e+00 : f32
    %cst_166 = arith.constant 0.000000e+00 : f32
    %455 = vector.broadcast %cst_165 : f32 to vector<1x5xf32>
    %456 = vector.broadcast %cst_166 : f32 to vector<1x5xf32>
    %457 = arith.select %454, %455, %456 : vector<1x5xi1>, vector<1x5xf32>
    %cst_167 = arith.constant 1.000000e+00 : f32
    %458 = vector.broadcast %cst_167 : f32 to vector<1x8xf32>
    %459 = arith.cmpf oeq, %354, %458 : vector<1x8xf32>
    %460 = vector.shape_cast %452 : vector<1x1xf32> to vector<1x1xf32>
    %461 = vector.broadcast %460 : vector<1x1xf32> to vector<1x8xf32>
    %462 = arith.select %459, %461, %445 : vector<1x8xi1>, vector<1x8xf32>
    %c1_168 = arith.constant 1 : index
    %c0_169 = arith.constant 0 : index
    %463 = vector.load %arg11[%c1_168, %c0_169] : memref<8x5xf32, #tpu.memory_space<vmem>>, vector<1x5xf32>
    %cst_170 = arith.constant 5.000000e-01 : f32
    %464 = vector.broadcast %cst_170 : f32 to vector<1x5xf32>
    %465 = arith.cmpf ogt, %457, %464 : vector<1x5xf32>
    %cst_171 = arith.constant -1.000000e+00 : f32
    %466 = vector.broadcast %cst_171 : f32 to vector<1x5xf32>
    %467 = arith.select %465, %463, %466 : vector<1x5xi1>, vector<1x5xf32>
    %cst_172 = arith.constant dense<0xFF800000> : vector<1xf32>
    %468 = vector.multi_reduction <maximumf>, %467, %cst_172 [1] : vector<1x5xf32> to vector<1xf32>
    %469 = vector.shape_cast %468 : vector<1xf32> to vector<1x1xf32>
    %cst_173 = arith.constant 0.000000e+00 : f32
    %470 = vector.broadcast %cst_173 : f32 to vector<1x8xf32>
    %471 = arith.cmpf oeq, %354, %470 : vector<1x8xf32>
    %472 = vector.shape_cast %469 : vector<1x1xf32> to vector<1x1xf32>
    %473 = vector.broadcast %472 : vector<1x1xf32> to vector<1x8xf32>
    %474 = arith.select %471, %473, %462 : vector<1x8xi1>, vector<1x8xf32>
    %475 = arith.fptosi %474 : vector<1x8xf32> to vector<1x8xi32>
    %c0_174 = arith.constant 0 : index
    %c0_175 = arith.constant 0 : index
    %476 = vector.load %arg7[%c0_174, %c0_175] : memref<1x8xi32, #tpu.memory_space<vmem>>, vector<1x8xi32>
    tpu.vector_store %arg7[%c0_174, %c0_175], %475 {strides = array<i32>} : memref<1x8xi32, #tpu.memory_space<vmem>>, vector<1x8xi32>,
    return
  }
}

</mosaic_0001>

<bundles_post_ra>
// kernel: _forward_impl.1
= control target key start
LH: loop header
LB: loop body
LE: loop exit
PB: predicated region body
PF: predicated region fallthrough
CT: control target
= control target key end

     0   :  { %14 = vsyncpa [#allocation6], 0  ;;  %vm37_vm0 = vcmask 261120   ;;  %s1967_s0 = inlined_call_operand.vmem [shape: f32[8,32], index: 0, kind: input, shape index: {}]   ;;  %s1968_s1 = inlined_call_operand.vmem [shape: f32[32,256], index: 1, kind: input, shape index: {}]   ;;  %s1969_s2 = inlined_call_operand.vmem [shape: f32[32,128], index: 2, kind: input, shape index: {}]   ;;  %s1970_s3 = inlined_call_operand.vmem [shape: f32[32,5], index: 3, kind: input, shape index: {}]   ;;  %s1971_s4 = inlined_call_operand.vmem [shape: f32[4,128], index: 4, kind: input, shape index: {}]   ;;  %s1972_s5 = inlined_call_operand.vmem [shape: f32[5,5], index: 5, kind: input, shape index: {}]   ;;  %s1973_s6 = inlined_call_operand.hbm [shape: f32[8,5], index: 6, kind: output, shape index: {0}]   ;;  %s1974_s7 = inlined_call_operand.hbm [shape: s32[1,8], index: 7, kind: output, shape index: {1}]   ;;  %s1975_s8 = inlined_call_operand.hbm [shape: f32[1,1], index: 8, kind: output, shape index: {2}]  }
   0x1   :  { %v87_v0 = vld [vmem:[%s1969_s2 + $0x18] sm:$0xff]  ;;  %v35_v1 = vld [vmem:[%s1968_s1 + $0x30] sm:$0xff]  ;;  %v33_v4 = vld [vmem:[%s1968_s1 + $0x20] sm:$0xff] }
   0x2   :  { %v36_v2 = vld [vmem:[%s1968_s1 + $0x38] sm:$0xff]  ;;  %109 = vmatpush.msra.mxu2 %v87_v0  ;;  %53 = vmatpush.msra.mxu0 %v35_v1  ;;  %v86_v3 = vld [vmem:[%s1969_s2 + $0x10] sm:$0xff]  ;;  %v34_v5 = vld [vmem:[%s1968_s1 + $0x28] sm:$0xff] }
   0x3   :  { %73 = vmatpush.msra.mxu1 %v36_v2  ;;  %v85_v6 = vld [vmem:[%s1969_s2 + $0x8] sm:$0xff]  ;;  %v31_v7 = vld [vmem:[%s1968_s1 + $0x10] sm:$0xff]  ;;  %186 = vmatpush.msra.mxu3 %v87_v0  ;;  %v32_v8 = vld [vmem:[%s1968_s1 + $0x18] sm:$0xff] }
   0x4   :  { %110 = vmatpush.msra.mxu2 %v86_v3  ;;  %54 = vmatpush.msra.mxu0 %v33_v4  ;;  %v84_v9 = vld [vmem:[%s1969_s2] sm:$0xff]  ;;  %v30_v12 = vld [vmem:[%s1968_s1 + $0x8] sm:$0xff] }
   0x5   :  { %74 = vmatpush.msra.mxu1 %v34_v5  ;;  %v88_v10 = vld [vmem:[%s1971_s4 + $0x1] sm:$0x1]  ;;  %187 = vmatpush.msra.mxu3 %v86_v3 }
   0x6   :  { %v29_v11 = vld [vmem:[%s1968_s1] sm:$0xff]  ;;  %111 = vmatpush.msra.mxu2 %v85_v6  ;;  %55 = vmatpush.msra.mxu0 %v31_v7 }
   0x7   :  { %15 = vsyncpa [#allocation8], 0  ;;  %75 = vmatpush.msra.mxu1 %v32_v8  ;;  %v28_v13 = vld [vmem:[%s1967_s0] sm:$0xff]  ;;  %188 = vmatpush.msra.mxu3 %v85_v6  ;;  %s1603_s10 = smov 64   ;;  %s1604_s13 = smov 32   ;;  %vm163_vm5 = vcmask 122880  }
   0x8   :  { %112 = vmatpush.msra.mxu2 %v84_v9  ;;  %56 = vmatpush.msra.mxu0 %v29_v11  ;;  %v1461_v14 = vld [vmem:[%s1971_s4] ss:$0 sm:$0xff]  ;;  %v89_v23 = vld [vmem:[%s1971_s4 + $0x2] sm:$0x1]  ;;  %s1605_s14 = smov 16   ;;  %s1608_s27 = smov 123  }
   0x9   :  { %1425 = vmatmul.msk.f32.vlgmr.msra.gmra.mxu2 %vm37_vm0, %v88_v10  ;;  %76 = vmatpush.msra.mxu1 %v30_v12  ;;  %s1383_s29 = sshll.u32 %s1973_s6, 4  ;;  %s1610_s30 = smov [#allocation5]   ;;  %s1384_s29 = int_to_ptr.hbm [resolvable:$true] %s1383_s29 }
   0xa   :  { %1423 = vmatmul.msk.f32.vlgmr.msra.gmra.mxu0 %vm37_vm0, %v28_v13  ;;  %1424 = vmatmul.msk.f32.vlgmr.msra.gmra.mxu1 %vm37_vm0, %v28_v13  ;;  %s1381_s2 = sshll.u32 %s1610_s30, 4  ;;  %s1611_s6 = smov [#allocation7]   ;;  %s1382_s2 = int_to_ptr.vmem [resolvable:$true] %s1381_s2 }
   0xb   :  { %189 = vmatpush.msra.mxu3 %v84_v9  ;;  %268 = vmatpush.msrb.mxu0 %v87_v0  ;;  %s1392_s9 = sshll.u32 %s1611_s6, 4  ;;  %s1612_s11 = smov [#allocation9]   ;;  %s1393_s9 = int_to_ptr.vmem [resolvable:$true] %s1392_s9 }
   0xc   :  { %350 = vmatpush.msrb.mxu1 %v87_v0  ;;  %429 = vmatpush.msrb.mxu2 %v87_v0  ;;  %s1403_s12 = sshll.u32 %s1612_s11, 4  ;;  %s1405_s15 = sshll.u32 %s1975_s8, 4  ;;  %s1404_s12 = int_to_ptr.vmem [resolvable:$true] %s1403_s12  ;;  %s1406_s15 = int_to_ptr.hbm [resolvable:$true] %s1405_s15 }
   0xd   :  { %269 = vmatpush.msrb.mxu0 %v86_v3  ;;  %508 = vmatpush.msrb.mxu3 %v87_v0 }
   0xe   :  { %351 = vmatpush.msrb.mxu1 %v86_v3  ;;  %430 = vmatpush.msrb.mxu2 %v86_v3 }
   0xf   :  { %270 = vmatpush.msrb.mxu0 %v85_v6  ;;  %509 = vmatpush.msrb.mxu3 %v86_v3 }
  0x10   :  { %352 = vmatpush.msrb.mxu1 %v85_v6  ;;  %431 = vmatpush.msrb.mxu2 %v85_v6 }
  0x11   :  { %271 = vmatpush.msrb.mxu0 %v84_v9  ;;  %510 = vmatpush.msrb.mxu3 %v85_v6 }
  0x12   :  { %353 = vmatpush.msrb.mxu1 %v84_v9  ;;  %432 = vmatpush.msrb.mxu2 %v84_v9 }
  0x13   :  { %511 = vmatpush.msrb.mxu3 %v84_v9  ;;  %587 = vmatpush.msra.mxu0 %v87_v0 }
  0x14   :  { %666 = vmatpush.msra.mxu1 %v87_v0 }
  0x15   :  { %588 = vmatpush.msra.mxu0 %v86_v3 }
  0x16   :  { %667 = vmatpush.msra.mxu1 %v86_v3 }
  0x17   :  { %589 = vmatpush.msra.mxu0 %v85_v6 }
  0x18   :  { %668 = vmatpush.msra.mxu1 %v85_v6 }
  0x19   :  { %590 = vmatpush.msra.mxu0 %v84_v9 }
  0x1a   :  { %669 = vmatpush.msra.mxu1 %v84_v9 }
  0x87   :  { %v58_v15 = vpop.f32.mrf.mxu0  ;;  %v1706_v16 = vpop.f32.mrf.mxu1 }
  0x88   :  { %v1708_v17 = vadd.f32 %v1461_v14, %v58_v15  ;;  %v91_v18 = vrot.slane %v1706_v16, 7  ;;  %v169_v47 = vrot.slane %v1706_v16, 5  ;;  %v248_v13 = vrot.slane %v1706_v16, 3 }
  0x8a   :  { %v1712_v19 = vadd.f32 %v91_v18, %v1708_v17  ;;  %v1730_v49 = vadd.f32 %v169_v47, %v1708_v17  ;;  %v1743_v15 = vadd.f32 %v248_v13, %v1708_v17  ;;  %v330_v47 = vrot.slane %v1706_v16, 1 }
  0x8c   :  { %v114_v20 = vpop.f32.mrf.mxu2 }
  0x8d   :  { %v117_v21 = vadd.f32 %v114_v20, %v1712_v19 }
  0x8f   :  { %1463 = vtanh.f32 %v117_v21  ;;  %v1426_v24 = vmul.f32 -1.442695, %v117_v21 }
  0x91   :  { %1465 = vpow2.f32 %v1426_v24 }
  0x95   :  { %v1464_v22 = vpop.eup %1463 }
  0x96   :  { %144 = vrot.lane.b32.xlu0 %v1464_v22, %s1603_s10 }
  0x97   :  { %v1466_v25 = vpop.eup %1465 }
  0x98   :  { %v121_v26 = vadd.f32 1.0, %v1466_v25 }
  0x9a   :  { %1467 = vrcp.f32 %v121_v26  ;;  %v133_v32 = vand.u32 2147483648, %v121_v26  ;;  %vm127_vm2 = vweird.f32 %v121_v26  ;;  %v131_v33 = vand.u32 2147483647, %v121_v26 }
  0x9c   :  { %v134_v35 = vor.u32 1.1754944e-38, %v133_v32  ;;  %vm132_vm4 = vcmp.eq.f32.partialorder %v131_v33, 8.507059e+37 }
  0x9e   :  { %139 = vrot.lane.b32.xlu0 %v89_v23, %s1604_s13 }
  0xa0   :  { %v1468_v27 = vpop.eup %1467 }
  0xa1   :  { %v123_v28 = vmul.f32 %v1468_v27, %v121_v26  ;;  %vm128_vm1 = vweird.f32 %v1468_v27 }
  0xa2   :  { %vm129_vm3 = vmor %vm127_vm2, %vm128_vm1 }
  0xa3   :  { %v124_v29 = vsub.f32 1.0, %v123_v28 }
  0xa5   :  { %v125_v30 = vmul.f32 %v1468_v27, %v124_v29 }
  0xa7   :  { %v126_v31 = vadd.f32 %v1468_v27, %v125_v30 }
  0xa9   :  { %v130_v34 = vsel %vm129_vm3, %v1468_v27, %v126_v31 }
  0xaa   :  { %v135_v37 = vsel %vm132_vm4, %v134_v35, %v130_v34 }
 0x108   :  { %v145_v36 = vpop.permute.xlu0 %144 }
 0x109   :  { %v147_v38 = vmul.f32 %v145_v36, %v135_v37 }
 0x10b   :  { %149 = vrot.lane.b32.xlu1 %v147_v38, %s1604_s13 }
 0x110   :  { %v140_v39 = vpop.permute.xlu0 %139 }
 0x111   :  { %v142_v40 = vmul.f32 %v140_v39, %v135_v37 }
 0x17d   :  { %v150_v41 = vpop.permute.xlu1 %149 }
 0x17e   :  { %v152_v42 = vadd.f32 %v150_v41, %v142_v40 }
 0x180   :  { %1469 = vtanh.f32 %v152_v42  ;;  %v219_v4 = vrot.slane %v152_v42, 7 }
 0x186   :  { %v1470_v43 = vpop.eup %1469 }
 0x187   :  { %155 = vrot.lane.b32.xlu1 %v1470_v43, %s1603_s10 }
 0x1f9   :  { %v156_v44 = vpop.permute.xlu1 %155 }
 0x1fa   :  { %v1722_v45 = vmul.f32 %v156_v44, %v135_v37 }
 0x1fc   :  { %160 = vrot.lane.b32.xlu2 %v1722_v45, %s1604_s13 }
 0x256   :  { %v161_v46 = vpop.permute.xlu2 %160 }
 0x257   :  { %1427 = vmatmul.msk.f32.vlgmr.msra.gmra.mxu3 %vm37_vm0, %v161_v46  ;;  %164 = vst.msk [vmem:[#allocation2] sm:$0x1] %vm163_vm5, %v161_v46 }
 0x2da   :  { %v191_v48 = vpop.f32.mrf.mxu3 }
 0x2db   :  { %v195_v50 = vrot.slane %v191_v48, 7 }
 0x2dd   :  { %v197_v51 = vadd.f32 %v195_v50, %v1730_v49  ;;  %v1756_v50 = vadd.f32 %v330_v47, %v1708_v17 }
 0x2df   :  { %1471 = vtanh.f32 %v197_v51  ;;  %v1428_v53 = vmul.f32 -1.442695, %v197_v51 }
 0x2e1   :  { %1473 = vpow2.f32 %v1428_v53 }
 0x2e5   :  { %v1472_v52 = vpop.eup %1471 }
 0x2e6   :  { %223 = vrot.lane.b32.xlu2 %v1472_v52, %s1603_s10 }
 0x2e7   :  { %v1474_v54 = vpop.eup %1473 }
 0x2e8   :  { %v201_v55 = vadd.f32 1.0, %v1474_v54 }
 0x2ea   :  { %1475 = vrcp.f32 %v201_v55  ;;  %v213_v61 = vand.u32 2147483648, %v201_v55  ;;  %vm207_vm7 = vweird.f32 %v201_v55  ;;  %v211_v62 = vand.u32 2147483647, %v201_v55 }
 0x2ec   :  { %v214_v0 = vor.u32 1.1754944e-38, %v213_v61  ;;  %vm212_vm9 = vcmp.eq.f32.partialorder %v211_v62, 8.507059e+37 }
 0x2f0   :  { %v1476_v56 = vpop.eup %1475 }
 0x2f1   :  { %v203_v57 = vmul.f32 %v1476_v56, %v201_v55  ;;  %vm208_vm6 = vweird.f32 %v1476_v56 }
 0x2f2   :  { %vm209_vm8 = vmor %vm207_vm7, %vm208_vm6 }
 0x2f3   :  { %v204_v58 = vsub.f32 1.0, %v203_v57 }
 0x2f5   :  { %v205_v59 = vmul.f32 %v1476_v56, %v204_v58 }
 0x2f7   :  { %v206_v60 = vadd.f32 %v1476_v56, %v205_v59 }
 0x2f9   :  { %v210_v63 = vsel %vm209_vm8, %v1476_v56, %v206_v60 }
 0x2fa   :  { %v215_v2 = vsel %vm212_vm9, %v214_v0, %v210_v63 }
 0x2fb   :  { %v221_v5 = vmul.f32 %v219_v4, %v215_v2 }
 0x340   :  { %v224_v1 = vpop.permute.xlu2 %223 }
 0x341   :  { %v226_v3 = vmul.f32 %v224_v1, %v215_v2 }
 0x343   :  { %228 = vrot.lane.b32.xlu0 %v226_v3, %s1604_s13 }
 0x3b5   :  { %v229_v6 = vpop.permute.xlu0 %228 }
 0x3b6   :  { %v231_v7 = vadd.f32 %v229_v6, %v221_v5 }
 0x3b8   :  { %1477 = vtanh.f32 %v231_v7  ;;  %v301_v37 = vrot.slane %v231_v7, 7 }
 0x3be   :  { %v1478_v8 = vpop.eup %1477 }
 0x3bf   :  { %234 = vrot.lane.b32.xlu1 %v1478_v8, %s1603_s10 }
 0x431   :  { %v235_v9 = vpop.permute.xlu1 %234 }
 0x432   :  { %v1736_v10 = vmul.f32 %v235_v9, %v215_v2 }
 0x434   :  { %v251_v11 = vrot.slane %v1736_v10, 1 }
 0x436   :  { %252 = vrot.lane.b32.xlu2 %v251_v11, %s1604_s13 }
 0x490   :  { %v253_v12 = vpop.permute.xlu2 %252 }
 0x491   :  { %1429 = vmatmul.msk.f32.vlgmr.msrb.gmra.mxu0 %vm37_vm0, %v253_v12 }
 0x50e   :  { %v273_v14 = vpop.f32.mrf.mxu0 }
 0x50f   :  { %v277_v18 = vrot.slane %v273_v14, 6 }
 0x511   :  { %v279_v20 = vadd.f32 %v277_v18, %v1743_v15 }
 0x513   :  { %1479 = vtanh.f32 %v279_v20  ;;  %v1430_v22 = vmul.f32 -1.442695, %v279_v20 }
 0x515   :  { %1481 = vpow2.f32 %v1430_v22 }
 0x519   :  { %v1480_v21 = vpop.eup %1479 }
 0x51a   :  { %305 = vrot.lane.b32.xlu0 %v1480_v21, %s1603_s10 }
 0x51b   :  { %v1482_v23 = vpop.eup %1481 }
 0x51c   :  { %v283_v24 = vadd.f32 1.0, %v1482_v23 }
 0x51e   :  { %1483 = vrcp.f32 %v283_v24  ;;  %v295_v30 = vand.u32 2147483648, %v283_v24  ;;  %vm289_vm11 = vweird.f32 %v283_v24  ;;  %v293_v31 = vand.u32 2147483647, %v283_v24 }
 0x520   :  { %v296_v33 = vor.u32 1.1754944e-38, %v295_v30  ;;  %vm294_vm13 = vcmp.eq.f32.partialorder %v293_v31, 8.507059e+37 }
 0x524   :  { %v1484_v25 = vpop.eup %1483 }
 0x525   :  { %v285_v26 = vmul.f32 %v1484_v25, %v283_v24  ;;  %vm290_vm10 = vweird.f32 %v1484_v25 }
 0x526   :  { %vm291_vm12 = vmor %vm289_vm11, %vm290_vm10 }
 0x527   :  { %v286_v27 = vsub.f32 1.0, %v285_v26 }
 0x529   :  { %v287_v28 = vmul.f32 %v1484_v25, %v286_v27 }
 0x52b   :  { %v288_v29 = vadd.f32 %v1484_v25, %v287_v28 }
 0x52d   :  { %v292_v32 = vsel %vm291_vm12, %v1484_v25, %v288_v29 }
 0x52e   :  { %v297_v35 = vsel %vm294_vm13, %v296_v33, %v292_v32 }
 0x52f   :  { %v303_v38 = vmul.f32 %v301_v37, %v297_v35 }
 0x58c   :  { %v306_v34 = vpop.permute.xlu0 %305 }
 0x58d   :  { %v308_v36 = vmul.f32 %v306_v34, %v297_v35 }
 0x58f   :  { %310 = vrot.lane.b32.xlu1 %v308_v36, %s1604_s13 }
 0x601   :  { %v311_v39 = vpop.permute.xlu1 %310 }
 0x602   :  { %v313_v40 = vadd.f32 %v311_v39, %v303_v38 }
 0x604   :  { %1485 = vtanh.f32 %v313_v40  ;;  %v383_v3 = vrot.slane %v313_v40, 7 }
 0x60a   :  { %v1486_v41 = vpop.eup %1485 }
 0x60b   :  { %316 = vrot.lane.b32.xlu2 %v1486_v41, %s1603_s10 }
 0x665   :  { %v317_v42 = vpop.permute.xlu2 %316 }
 0x666   :  { %v1749_v43 = vmul.f32 %v317_v42, %v297_v35 }
 0x668   :  { %v333_v44 = vrot.slane %v1749_v43, 2 }
 0x66a   :  { %334 = vrot.lane.b32.xlu0 %v333_v44, %s1604_s13 }
 0x6dc   :  { %v335_v46 = vpop.permute.xlu0 %334 }
 0x6dd   :  { %1431 = vmatmul.msk.f32.vlgmr.msrb.gmra.mxu1 %vm37_vm0, %v335_v46 }
 0x75a   :  { %v355_v48 = vpop.f32.mrf.mxu1 }
 0x75b   :  { %v359_v51 = vrot.slane %v355_v48, 5 }
 0x75d   :  { %v361_v52 = vadd.f32 %v359_v51, %v1756_v50 }
 0x75f   :  { %1487 = vtanh.f32 %v361_v52  ;;  %v1432_v54 = vmul.f32 -1.442695, %v361_v52 }
 0x761   :  { %1489 = vpow2.f32 %v1432_v54 }
 0x765   :  { %v1488_v53 = vpop.eup %1487 }
 0x766   :  { %387 = vrot.lane.b32.xlu1 %v1488_v53, %s1603_s10 }
 0x767   :  { %v1490_v55 = vpop.eup %1489 }
 0x768   :  { %v365_v56 = vadd.f32 1.0, %v1490_v55 }
 0x76a   :  { %1491 = vrcp.f32 %v365_v56  ;;  %v377_v17 = vand.u32 2147483648, %v365_v56  ;;  %vm371_vm15 = vweird.f32 %v365_v56  ;;  %v375_v61 = vand.u32 2147483647, %v365_v56 }
 0x76c   :  { %v378_v63 = vor.u32 1.1754944e-38, %v377_v17  ;;  %vm376_vm2 = vcmp.eq.f32.partialorder %v375_v61, 8.507059e+37 }
 0x770   :  { %v1492_v57 = vpop.eup %1491 }
 0x771   :  { %v367_v58 = vmul.f32 %v1492_v57, %v365_v56  ;;  %vm372_vm14 = vweird.f32 %v1492_v57 }
 0x772   :  { %vm373_vm1 = vmor %vm371_vm15, %vm372_vm14 }
 0x773   :  { %v368_v59 = vsub.f32 1.0, %v367_v58 }
 0x775   :  { %v369_v16 = vmul.f32 %v1492_v57, %v368_v59 }
 0x777   :  { %v370_v60 = vadd.f32 %v1492_v57, %v369_v16 }
 0x779   :  { %v374_v62 = vsel %vm373_vm1, %v1492_v57, %v370_v60 }
 0x77a   :  { %v379_v1 = vsel %vm376_vm2, %v378_v63, %v374_v62 }
 0x77b   :  { %v385_v4 = vmul.f32 %v383_v3, %v379_v1 }
 0x7d8   :  { %v388_v0 = vpop.permute.xlu1 %387 }
 0x7d9   :  { %v390_v2 = vmul.f32 %v388_v0, %v379_v1 }
 0x7db   :  { %392 = vrot.lane.b32.xlu2 %v390_v2, %s1604_s13 }
 0x835   :  { %v393_v5 = vpop.permute.xlu2 %392 }
 0x836   :  { %v395_v6 = vadd.f32 %v393_v5, %v385_v4 }
 0x838   :  { %1493 = vtanh.f32 %v395_v6  ;;  %v462_v35 = vrot.slane %v395_v6, 7 }
 0x83e   :  { %v1494_v7 = vpop.eup %1493 }
 0x83f   :  { %398 = vrot.lane.b32.xlu0 %v1494_v7, %s1603_s10 }
 0x8b1   :  { %v399_v8 = vpop.permute.xlu0 %398 }
 0x8b2   :  { %v1762_v9 = vmul.f32 %v399_v8, %v379_v1 }
 0x8b4   :  { %v412_v11 = vrot.slane %v1762_v9, 3 }
 0x8b6   :  { %413 = vrot.lane.b32.xlu1 %v412_v11, %s1604_s13 }
 0x928   :  { %v414_v12 = vpop.permute.xlu1 %413 }
 0x929   :  { %1433 = vmatmul.msk.f32.vlgmr.msrb.gmra.mxu2 %vm37_vm0, %v414_v12 }
 0x9ac   :  { %v434_v13 = vpop.f32.mrf.mxu2 }
 0x9ad   :  { %v438_v14 = vrot.slane %v434_v13, 4 }
 0x9af   :  { %v440_v18 = vadd.f32 %v438_v14, %v1712_v19 }
 0x9b1   :  { %1495 = vtanh.f32 %v440_v18  ;;  %v1434_v21 = vmul.f32 -1.442695, %v440_v18 }
 0x9b3   :  { %1497 = vpow2.f32 %v1434_v21 }
 0x9b7   :  { %v1496_v20 = vpop.eup %1495 }
 0x9b8   :  { %466 = vrot.lane.b32.xlu2 %v1496_v20, %s1603_s10 }
 0x9b9   :  { %v1498_v22 = vpop.eup %1497 }
 0x9ba   :  { %v444_v23 = vadd.f32 1.0, %v1498_v22 }
 0x9bc   :  { %1499 = vrcp.f32 %v444_v23  ;;  %v456_v29 = vand.u32 2147483648, %v444_v23  ;;  %vm450_vm4 = vweird.f32 %v444_v23  ;;  %v454_v30 = vand.u32 2147483647, %v444_v23 }
 0x9be   :  { %v457_v31 = vor.u32 1.1754944e-38, %v456_v29  ;;  %vm455_vm7 = vcmp.eq.f32.partialorder %v454_v30, 8.507059e+37 }
 0x9c2   :  { %v1500_v24 = vpop.eup %1499 }
 0x9c3   :  { %v446_v25 = vmul.f32 %v1500_v24, %v444_v23  ;;  %vm451_vm3 = vweird.f32 %v1500_v24 }
 0x9c4   :  { %vm452_vm6 = vmor %vm450_vm4, %vm451_vm3  ;;  %vm324_vm4 = vcmask 124930  }
 0x9c5   :  { %v447_v26 = vsub.f32 1.0, %v446_v25 }
 0x9c7   :  { %v448_v27 = vmul.f32 %v1500_v24, %v447_v26 }
 0x9c9   :  { %v449_v28 = vadd.f32 %v1500_v24, %v448_v27 }
 0x9cb   :  { %v453_v19 = vsel %vm452_vm6, %v1500_v24, %v449_v28  ;;  %vm406_vm6 = vcmask 125955  }
 0x9cc   :  { %v458_v33 = vsel %vm455_vm7, %v457_v31, %v453_v19  ;;  %vm564_vm7 = vcmask 128005  }
 0x9cd   :  { %v464_v36 = vmul.f32 %v462_v35, %v458_v33 }
 0xa12   :  { %v467_v32 = vpop.permute.xlu2 %466 }
 0xa13   :  { %v469_v34 = vmul.f32 %v467_v32, %v458_v33 }
 0xa15   :  { %471 = vrot.lane.b32.xlu0 %v469_v34, %s1604_s13 }
 0xa87   :  { %v472_v37 = vpop.permute.xlu0 %471 }
 0xa88   :  { %v474_v38 = vadd.f32 %v472_v37, %v464_v36 }
 0xa8a   :  { %1501 = vtanh.f32 %v474_v38  ;;  %v541_v0 = vrot.slane %v474_v38, 7 }
 0xa90   :  { %v1502_v39 = vpop.eup %1501 }
 0xa91   :  { %477 = vrot.lane.b32.xlu1 %v1502_v39, %s1603_s10 }
 0xb03   :  { %v478_v40 = vpop.permute.xlu1 %477 }
 0xb04   :  { %v1771_v41 = vmul.f32 %v478_v40, %v458_v33 }
 0xb06   :  { %v491_v42 = vrot.slane %v1771_v41, 4 }
 0xb08   :  { %492 = vrot.lane.b32.xlu2 %v491_v42, %s1604_s13 }
 0xb62   :  { %v493_v44 = vpop.permute.xlu2 %492 }
 0xb63   :  { %1435 = vmatmul.msk.f32.vlgmr.msrb.gmra.mxu3 %vm37_vm0, %v493_v44 }
 0xbe6   :  { %v513_v46 = vpop.f32.mrf.mxu3 }
 0xbe7   :  { %v517_v47 = vrot.slane %v513_v46, 3 }
 0xbe9   :  { %v519_v48 = vadd.f32 %v517_v47, %v1730_v49 }
 0xbeb   :  { %1503 = vtanh.f32 %v519_v48  ;;  %v1436_v52 = vmul.f32 -1.442695, %v519_v48 }
 0xbed   :  { %1505 = vpow2.f32 %v1436_v52 }
 0xbf1   :  { %v1504_v51 = vpop.eup %1503 }
 0xbf2   :  { %545 = vrot.lane.b32.xlu0 %v1504_v51, %s1603_s10 }
 0xbf3   :  { %v1506_v53 = vpop.eup %1505 }
 0xbf4   :  { %v523_v54 = vadd.f32 1.0, %v1506_v53 }
 0xbf6   :  { %1507 = vrcp.f32 %v523_v54  ;;  %v535_v16 = vand.u32 2147483648, %v523_v54  ;;  %vm529_vm9 = vweird.f32 %v523_v54  ;;  %v533_v60 = vand.u32 2147483647, %v523_v54 }
 0xbf8   :  { %v536_v17 = vor.u32 1.1754944e-38, %v535_v16  ;;  %vm534_vm11 = vcmp.eq.f32.partialorder %v533_v60, 8.507059e+37 }
 0xbfc   :  { %v1508_v55 = vpop.eup %1507 }
 0xbfd   :  { %v525_v56 = vmul.f32 %v1508_v55, %v523_v54  ;;  %vm530_vm8 = vweird.f32 %v1508_v55 }
 0xbfe   :  { %vm531_vm10 = vmor %vm529_vm9, %vm530_vm8  ;;  %vm242_vm8 = vcmask 123905  }
 0xbff   :  { %v526_v57 = vsub.f32 1.0, %v525_v56 }
 0xc01   :  { %v527_v58 = vmul.f32 %v1508_v55, %v526_v57 }
 0xc03   :  { %v528_v59 = vadd.f32 %v1508_v55, %v527_v58 }
 0xc05   :  { %v532_v49 = vsel %vm531_vm10, %v1508_v55, %v528_v59  ;;  %vm485_vm10 = vcmask 126980  }
 0xc06   :  { %v537_v62 = vsel %vm534_vm11, %v536_v17, %v532_v49  ;;  %vm722_vm11 = vcmask 130055  }
 0xc07   :  { %v543_v1 = vmul.f32 %v541_v0, %v537_v62 }
 0xc64   :  { %v546_v61 = vpop.permute.xlu0 %545 }
 0xc65   :  { %v548_v63 = vmul.f32 %v546_v61, %v537_v62 }
 0xc67   :  { %550 = vrot.lane.b32.xlu1 %v548_v63, %s1604_s13 }
 0xcd9   :  { %v551_v2 = vpop.permute.xlu1 %550 }
 0xcda   :  { %v553_v3 = vadd.f32 %v551_v2, %v543_v1 }
 0xcdc   :  { %1509 = vtanh.f32 %v553_v3  ;;  %v620_v32 = vrot.slane %v553_v3, 7 }
 0xce2   :  { %v1510_v4 = vpop.eup %1509 }
 0xce3   :  { %556 = vrot.lane.b32.xlu2 %v1510_v4, %s1603_s10 }
 0xd3d   :  { %v557_v5 = vpop.permute.xlu2 %556 }
 0xd3e   :  { %v1780_v6 = vmul.f32 %v557_v5, %v537_v62 }
 0xd40   :  { %v570_v7 = vrot.slane %v1780_v6, 5 }
 0xd42   :  { %571 = vrot.lane.b32.xlu0 %v570_v7, %s1604_s13  ;;  %v786_v7 = vlaneseq }
 0xdb4   :  { %v572_v8 = vpop.permute.xlu0 %571 }
 0xdb5   :  { %1437 = vmatmul.msk.f32.vlgmr.msra.gmra.mxu0 %vm37_vm0, %v572_v8  ;;  %v787_v8 = vand.u32 127, %v786_v7 }
 0xe32   :  { %v592_v11 = vpop.f32.mrf.mxu0 }
 0xe33   :  { %v596_v12 = vrot.slane %v592_v11, 2 }
 0xe35   :  { %v598_v13 = vadd.f32 %v596_v12, %v1743_v15  ;;  %v1606_v12 = vmov -10000.0  }
 0xe37   :  { %1511 = vtanh.f32 %v598_v13  ;;  %v1438_v18 = vmul.f32 -1.442695, %v598_v13 }
 0xe39   :  { %1513 = vpow2.f32 %v1438_v18 }
 0xe3d   :  { %v1512_v14 = vpop.eup %1511 }
 0xe3e   :  { %624 = vrot.lane.b32.xlu1 %v1512_v14, %s1603_s10 }
 0xe3f   :  { %v1514_v20 = vpop.eup %1513 }
 0xe40   :  { %v602_v21 = vadd.f32 1.0, %v1514_v20 }
 0xe42   :  { %1515 = vrcp.f32 %v602_v21  ;;  %v614_v27 = vand.u32 2147483648, %v602_v21  ;;  %vm608_vm13 = vweird.f32 %v602_v21  ;;  %v612_v28 = vand.u32 2147483647, %v602_v21 }
 0xe44   :  { %v615_v29 = vor.u32 1.1754944e-38, %v614_v27  ;;  %vm613_vm15 = vcmp.eq.f32.partialorder %v612_v28, 8.507059e+37  ;;  %v730_v27 = vld [vmem:[%s1970_s3 + $0x10] sm:$0xff]  ;;  %v728_v28 = vld [vmem:[%s1970_s3] sm:$0xff] }
 0xe48   :  { %v1516_v22 = vpop.eup %1515 }
 0xe49   :  { %v604_v23 = vmul.f32 %v1516_v22, %v602_v21  ;;  %vm609_vm12 = vweird.f32 %v1516_v22 }
 0xe4a   :  { %vm610_vm14 = vmor %vm608_vm13, %vm609_vm12  ;;  %vm734_vm12 = vcmask 130048   ;;  %vm833_vm13 = vcmask 36864  }
 0xe4b   :  { %v605_v24 = vsub.f32 1.0, %v604_v23 }
 0xe4d   :  { %v606_v25 = vmul.f32 %v1516_v22, %v605_v24 }
 0xe4f   :  { %v607_v26 = vadd.f32 %v1516_v22, %v606_v25  ;;  %v731_v25 = vld [vmem:[%s1970_s3 + $0x18] sm:$0xff] }
 0xe50   :  { %752 = vmatpush.msra.mxu2 %v731_v25 }
 0xe51   :  { %v611_v15 = vsel %vm610_vm14, %v1516_v22, %v607_v26  ;;  %v729_v26 = vld [vmem:[%s1970_s3 + $0x8] sm:$0xff]  ;;  %vm850_vm14 = vcmask 32768  }
 0xe52   :  { %v616_v19 = vsel %vm613_vm15, %v615_v29, %v611_v15  ;;  %775 = vmatpush.msra.mxu3 %v729_v26  ;;  %753 = vmatpush.msra.mxu2 %v730_v27  ;;  %vm784_vm15 = vcmask 39936  }
 0xe53   :  { %v622_v33 = vmul.f32 %v620_v32, %v616_v19 }
 0xe54   :  { %776 = vmatpush.msra.mxu3 %v728_v28 }
 0xeb0   :  { %v625_v30 = vpop.permute.xlu1 %624 }
 0xeb1   :  { %v627_v31 = vmul.f32 %v625_v30, %v616_v19 }
 0xeb3   :  { %629 = vrot.lane.b32.xlu2 %v627_v31, %s1604_s13  ;;  %v1865_v31 = vld [vmem:[%s1972_s5] sm:$0x1f] }
 0xf0d   :  { %v630_v34 = vpop.permute.xlu2 %629 }
 0xf0e   :  { %v1788_v35 = vadd.f32 %v630_v34, %v622_v33 }
 0xf10   :  { %1517 = vtanh.f32 %v1788_v35 }
 0xf16   :  { %v1518_v36 = vpop.eup %1517 }
 0xf17   :  { %635 = vrot.lane.b32.xlu0 %v1518_v36, %s1603_s10 }
 0xf89   :  { %v636_v37 = vpop.permute.xlu0 %635 }
 0xf8a   :  { %v1792_v38 = vmul.f32 %v636_v37, %v616_v19 }
 0xf8c   :  { %v649_v39 = vrot.slane %v1792_v38, 6 }
 0xf8e   :  { %650 = vrot.lane.b32.xlu1 %v649_v39, %s1604_s13 }
0x1000   :  { %v651_v40 = vpop.permute.xlu1 %650 }
0x1001   :  { %1439 = vmatmul.msk.f32.vlgmr.msra.gmra.mxu1 %vm37_vm0, %v651_v40 }
0x107e   :  { %v671_v42 = vpop.f32.mrf.mxu1 }
0x107f   :  { %v675_v44 = vrot.slane %v671_v42, 1 }
0x1081   :  { %v677_v46 = vadd.f32 %v675_v44, %v1756_v50 }
0x1083   :  { %1519 = vtanh.f32 %v677_v46  ;;  %v1440_v50 = vmul.f32 -1.442695, %v677_v46 }
0x1085   :  { %1521 = vpow2.f32 %v1440_v50 }
0x1089   :  { %v1520_v47 = vpop.eup %1519 }
0x108a   :  { %703 = vrot.lane.b32.xlu2 %v1520_v47, %s1603_s10  ;;  %v1462_v47 = vld [vmem:[%s1971_s4 + $0x3] ss:$0 sm:$0xff] }
0x108b   :  { %v1522_v48 = vpop.eup %1521 }
0x108c   :  { %v681_v51 = vadd.f32 1.0, %v1522_v48 }
0x108e   :  { %1523 = vrcp.f32 %v681_v51  ;;  %v693_v56 = vand.u32 2147483648, %v681_v51  ;;  %vm687_vm1 = vweird.f32 %v681_v51  ;;  %v691_v57 = vand.u32 2147483647, %v681_v51 }
0x1090   :  { %v694_v59 = vor.u32 1.1754944e-38, %v693_v56  ;;  %vm692_vm3 = vcmp.eq.f32.partialorder %v691_v57, 8.507059e+37 }
0x1092   :  { %165 = vrot.lane.b32.xlu2 %v1722_v45, %s1605_s14 }
0x1094   :  { %v1524_v52 = vpop.eup %1523 }
0x1095   :  { %v683_v53 = vmul.f32 %v1524_v52, %v681_v51  ;;  %vm688_vm0 = vweird.f32 %v1524_v52 }
0x1096   :  { %vm689_vm2 = vmor %vm687_vm1, %vm688_vm0 }
0x1097   :  { %v684_v45 = vsub.f32 1.0, %v683_v53 }
0x1099   :  { %v685_v54 = vmul.f32 %v1524_v52, %v684_v45 }
0x109a   :  { %321 = vrot.lane.b32.xlu2 %v1749_v43, %s1604_s13 }
0x109b   :  { %v686_v55 = vadd.f32 %v1524_v52, %v685_v54 }
0x109d   :  { %v690_v58 = vsel %vm689_vm2, %v1524_v52, %v686_v55 }
0x109e   :  { %v695_v60 = vsel %vm692_vm3, %v694_v59, %v690_v58 }
0x10a2   :  { %408 = vrot.lane.b32.xlu2 %v1762_v9, %s1605_s14 }
0x10aa   :  { %561 = vrot.lane.b32.xlu2 %v1780_v6, %s1604_s13 }
0x10b2   :  { %645 = vrot.lane.b32.xlu2 %v1792_v38, %s1605_s14 }
0x10e4   :  { %v704_v16 = vpop.permute.xlu2 %703 }
0x10e5   :  { %v706_v49 = vmul.f32 %v704_v16, %v695_v60 }
0x10e7   :  { %708 = vrot.lane.b32.xlu0 %v706_v49, %s1604_s13 }
0x10ec   :  { %v166_v17 = vpop.permute.xlu2 %165 }
0x10ed   :  { %168 = vst.msk [vmem:[#allocation3 + $0x7] sm:$0x1] %vm163_vm5, %v166_v17  ;;  %vm643_vm5 = vcmask 129030  }
0x10ef   :  { %239 = vrot.lane.b32.xlu0 %v1736_v10, %s1604_s13 }
0x10f4   :  { %v322_v61 = vpop.permute.xlu2 %321 }
0x10f5   :  { %325 = vst.msk [vmem:[#allocation2] sm:$0x4] %vm324_vm4, %v322_v61 }
0x10f7   :  { %326 = vrot.lane.b32.xlu0 %v1749_v43, %s1605_s14  ;;  %v699_v43 = vrot.slane %v1788_v35, 7 }
0x10f9   :  { %v701_v1 = vmul.f32 %v699_v43, %v695_v60 }
0x10fc   :  { %v409_v62 = vpop.permute.xlu2 %408 }
0x10fd   :  { %411 = vst.msk [vmem:[#allocation3 + $0x1] sm:$0x8] %vm406_vm6, %v409_v62 }
0x10ff   :  { %482 = vrot.lane.b32.xlu0 %v1771_v41, %s1604_s13 }
0x1104   :  { %v562_v63 = vpop.permute.xlu2 %561 }
0x1105   :  { %565 = vst.msk [vmem:[#allocation2] sm:$0x20] %vm564_vm7, %v562_v63 }
0x1107   :  { %566 = vrot.lane.b32.xlu0 %v1780_v6, %s1605_s14  ;;  %v1826_v6 = vcvt.s32.f32 %v787_v8 }
0x1109   :  { %vm792_vm9 = vcmp.eq.f32.partialorder %v1826_v6, 3.0 }
0x110a   :  { %v793_v13 = vsel %vm792_vm9, 0.0, %v1606_v12 }
0x110b   :  { %795 = vxpose.xlu2.b32.start.end [1/1] (short) (narrow) %v793_v13, 8 }
0x110c   :  { %v646_v0 = vpop.permute.xlu2 %645 }
0x110d   :  { %648 = vst.msk [vmem:[#allocation3 - $0x5] sm:$0x40] %vm643_vm5, %v646_v0 }
0x1159   :  { %v709_v2 = vpop.permute.xlu0 %708 }
0x115a   :  { %v711_v3 = vadd.f32 %v709_v2, %v701_v1 }
0x115c   :  { %1525 = vtanh.f32 %v711_v3 }
0x1161   :  { %v240_v4 = vpop.permute.xlu0 %239 }
0x1162   :  { %v1526_v5 = vpop.eup %1525  ;;  %243 = vst.msk [vmem:[#allocation2] sm:$0x2] %vm242_vm8, %v240_v4 }
0x1163   :  { %714 = vrot.lane.b32.xlu1 %v1526_v5, %s1603_s10  ;;  %s1394_s10 = sshll.u32 %s1974_s7, 4  ;;  %s1395_s10 = int_to_ptr.hbm [resolvable:$true] %s1394_s10 }
0x1169   :  { %v327_v11 = vpop.permute.xlu0 %326 }
0x116a   :  { %329 = vst.msk [vmem:[#allocation3 + $0x3] sm:$0x4] %vm324_vm4, %v327_v11 }
0x116b   :  { %244 = vrot.lane.b32.xlu1 %v1736_v10, %s1605_s14  ;;  %v1607_v10 = vmov 0  }
0x116c   :  { %1458 = vset.pattern.permute.xlu0 %v1607_v10 }
0x116d   :  { %1459 = vset.pattern.permute.xlu2 %v1607_v10 }
0x1171   :  { %v483_v14 = vpop.permute.xlu0 %482 }
0x1172   :  { %486 = vst.msk [vmem:[#allocation2] sm:$0x10] %vm485_vm10, %v483_v14 }
0x1173   :  { %403 = vrot.lane.b32.xlu1 %v1762_v9, %s1604_s13 }
0x1179   :  { %v567_v18 = vpop.permute.xlu0 %566 }
0x117a   :  { %569 = vst.msk [vmem:[#allocation3 - $0x3] sm:$0x20] %vm564_vm7, %v567_v18 }
0x117b   :  { %487 = vrot.lane.b32.xlu1 %v1771_v41, %s1605_s14 }
0x1183   :  { %640 = vrot.lane.b32.xlu1 %v1792_v38, %s1604_s13  ;;  %v790_v38 = vshrl.u32 %v786_v7, 7 }
0x1185   :  { %v1869_v42 = vcvt.s32.f32 %v790_v38 }
0x11a4   :  { %v811_v24 = vpop.trf.xlu2 }
0x11d5   :  { %v715_v20 = vpop.permute.xlu1 %714 }
0x11d6   :  { %v717_v21 = vmul.f32 %v715_v20, %v695_v60 }
0x11d8   :  { %724 = vrot.lane.b32.xlu1 %v717_v21, %s1605_s14  ;;  %719 = vrot.lane.b32.xlu0 %v717_v21, %s1604_s13 }
0x11dd   :  { %v245_v9 = vpop.permute.xlu1 %244 }
0x11de   :  { %247 = vst.msk [vmem:[#allocation3 + $0x5] sm:$0x2] %vm242_vm8, %v245_v9  ;;  %vm1281_vm8 = vcmask 7175  }
0x11e0   :  { %829 = vperm.xlu0 %1458, %v811_v24  }
0x11e5   :  { %v404_v22 = vpop.permute.xlu1 %403 }
0x11e6   :  { %407 = vst.msk [vmem:[#allocation2] sm:$0x8] %vm406_vm6, %v404_v22 }
0x11ed   :  { %v488_v41 = vpop.permute.xlu1 %487 }
0x11ee   :  { %490 = vst.msk [vmem:[#allocation3 - $0x1] sm:$0x10] %vm485_vm10, %v488_v41 }
0x11f5   :  { %v641_v23 = vpop.permute.xlu1 %640 }
0x11f6   :  { %644 = vst.msk [vmem:[#allocation2] sm:$0x40] %vm643_vm5, %v641_v23  ;;  %vm1270_vm5 = vcmask 39943  }
0x124a   :  { %v720_v15 = vpop.permute.xlu0 %719  ;;  %v725_v29 = vpop.permute.xlu1 %724 }
0x124b   :  { %723 = vst.msk [vmem:[#allocation2] sm:$0x80] %vm722_vm11, %v720_v15 }
0x124c   :  { %727 = vst.msk [vmem:[#allocation3 - $0x7] sm:$0x80] %vm722_vm11, %v725_v29 }
0x1252   :  { %v732_v30 = vld [vmem:[#allocation2] sm:$0xff]  ;;  %v830_v32 = vpop.permute.xlu0 %829 }
0x1253   :  { %v733_v19 = vld [vmem:[#allocation3] sm:$0xff]  ;;  %1442 = vmatmul.msk.f32.vlgmr.msra.gmra.mxu3 %vm734_vm12, %v732_v30  ;;  %v832_v33 = vadd.f32 %v830_v32, %v1865_v31 }
0x1254   :  { %1441 = vmatmul.msk.f32.vlgmr.msra.gmra.mxu2 %vm734_vm12, %v733_v19 }
0x1255   :  { %v834_v34 = vsel %vm833_vm13, %v832_v33, -inf }
0x1256   :  { %v835_v35 = vrot.slane %v834_v34, 4 }
0x1258   :  { %v836_v36 = vmax.f32 %v834_v34, %v835_v35 }
0x125a   :  { %v837_v37 = vrot.slane %v836_v36, 2 }
0x125c   :  { %v838_v39 = vmax.f32 %v836_v36, %v837_v37 }
0x125e   :  { %v839_v40 = vrot.slane %v838_v39, 1 }
0x1260   :  { %v840_v44 = vmax.f32 %v838_v39, %v839_v40 }
0x12d6   :  { %v778_v46 = vpop.f32.mrf.mxu3 }
0x12d7   :  { %v755_v50 = vpop.f32.mrf.mxu2 }
0x12d8   :  { %v779_v48 = vadd.f32 %v778_v46, %v755_v50 }
0x12da   :  { %v1874_v51 = vadd.f32 %v1462_v47, %v779_v48 }
0x12dc   :  { %v852_v52 = vadd.f32 %v840_v44, %v1874_v51  ;;  %785 = vst.msk [vmem:[#allocation5] sm:$0xff] %vm784_vm15, %v1874_v51 }
0x12dd   :  { %1386 = dma.vmem_to_hbm [thread:$0]  %s1382_s2, 128, %s1384_s29, [#allocation6]  }
0x12de   :  { %853 = vxpose.xlu1.b32.start.end [1/1] (short) (narrow) %v852_v52, 8 }
0x1382   :  { %v869_v53 = vpop.trf.xlu1 }
0x1383   :  { %887 = vperm.xlu0 %1458, %v869_v53  }
0x13f5   :  { %v888_v45 = vpop.permute.xlu0 %887 }
0x13f6   :  { %v890_v54 = vadd.f32 %v888_v45, %v1865_v31 }
0x13f8   :  { %v891_v55 = vsel %vm833_vm13, %v890_v54, -inf }
0x13f9   :  { %v892_v56 = vrot.slane %v891_v55, 4 }
0x13fb   :  { %v893_v57 = vmax.f32 %v891_v55, %v892_v56 }
0x13fd   :  { %v894_v58 = vrot.slane %v893_v57, 2 }
0x13ff   :  { %v895_v59 = vmax.f32 %v893_v57, %v894_v58 }
0x1401   :  { %v896_v16 = vrot.slane %v895_v59, 1 }
0x1403   :  { %v897_v60 = vmax.f32 %v895_v59, %v896_v16 }
0x1405   :  { %vm898_vm0 = vcmp.eq.f32.partialorder %v890_v54, %v897_v60  ;;  %v908_v49 = vadd.f32 %v897_v60, %v1874_v51 }
0x1406   :  { %v899_v17 = vsel %vm898_vm0, %v1869_v42, 5.0 }
0x1407   :  { %v900_v61 = vsel %vm833_vm13, %v899_v17, inf  ;;  %v910_v62 = vrot.slane %v908_v49, 1 }
0x1408   :  { %v901_v63 = vrot.slane %v900_v61, 4 }
0x1409   :  { %912 = vxpose.xlu0.b32.start.end [1/1] (short) (narrow) %v910_v62, 8 }
0x140a   :  { %v902_v0 = vmin.f32 %v900_v61, %v901_v63 }
0x140c   :  { %v903_v43 = vrot.slane %v902_v0, 2 }
0x140e   :  { %v904_v1 = vmin.f32 %v902_v0, %v903_v43 }
0x1410   :  { %v905_v2 = vrot.slane %v904_v1, 1 }
0x1412   :  { %v906_v3 = vmin.f32 %v904_v1, %v905_v2 }
0x1414   :  { %907 = vst.msk [vmem:[#allocation4 + $0x1] sm:$0x1] %vm850_vm14, %v906_v3 }
0x14ad   :  { %v928_v4 = vpop.trf.xlu0 }
0x14ae   :  { %946 = vperm.xlu2 %1459, %v928_v4  }
0x1508   :  { %v947_v5 = vpop.permute.xlu2 %946 }
0x1509   :  { %v949_v7 = vadd.f32 %v947_v5, %v1865_v31 }
0x150b   :  { %v950_v8 = vsel %vm833_vm13, %v949_v7, -inf }
0x150c   :  { %v951_v11 = vrot.slane %v950_v8, 4 }
0x150e   :  { %v952_v12 = vmax.f32 %v950_v8, %v951_v11 }
0x1510   :  { %v953_v13 = vrot.slane %v952_v12, 2 }
0x1512   :  { %v954_v14 = vmax.f32 %v952_v12, %v953_v13 }
0x1514   :  { %v955_v18 = vrot.slane %v954_v14, 1 }
0x1516   :  { %v956_v20 = vmax.f32 %v954_v14, %v955_v18 }
0x1518   :  { %vm957_vm1 = vcmp.eq.f32.partialorder %v949_v7, %v956_v20  ;;  %v967_v21 = vadd.f32 %v956_v20, %v1874_v51 }
0x1519   :  { %v958_v9 = vsel %vm957_vm1, %v1869_v42, 5.0 }
0x151a   :  { %v959_v22 = vsel %vm833_vm13, %v958_v9, inf  ;;  %v969_v41 = vrot.slane %v967_v21, 2 }
0x151b   :  { %v960_v23 = vrot.slane %v959_v22, 4 }
0x151c   :  { %971 = vxpose.xlu1.b32.start.end [1/1] (short) (narrow) %v969_v41, 8 }
0x151d   :  { %v961_v24 = vmin.f32 %v959_v22, %v960_v23 }
0x151f   :  { %v962_v25 = vrot.slane %v961_v24, 2 }
0x1521   :  { %v963_v26 = vmin.f32 %v961_v24, %v962_v25 }
0x1523   :  { %v964_v27 = vrot.slane %v963_v26, 1 }
0x1525   :  { %v965_v28 = vmin.f32 %v963_v26, %v964_v27 }
0x1527   :  { %966 = vst.msk [vmem:[#allocation4 + $0x2] sm:$0x1] %vm850_vm14, %v965_v28 }
0x15c0   :  { %v987_v15 = vpop.trf.xlu1 }
0x15c1   :  { %1005 = vperm.xlu0 %1458, %v987_v15  }
0x1633   :  { %v1006_v29 = vpop.permute.xlu0 %1005 }
0x1634   :  { %v1008_v30 = vadd.f32 %v1006_v29, %v1865_v31 }
0x1636   :  { %v1009_v19 = vsel %vm833_vm13, %v1008_v30, -inf }
0x1637   :  { %v1010_v32 = vrot.slane %v1009_v19, 4 }
0x1639   :  { %v1011_v33 = vmax.f32 %v1009_v19, %v1010_v32 }
0x163b   :  { %v1012_v34 = vrot.slane %v1011_v33, 2 }
0x163d   :  { %v1013_v35 = vmax.f32 %v1011_v33, %v1012_v34 }
0x163f   :  { %v1014_v36 = vrot.slane %v1013_v35, 1 }
0x1641   :  { %v1015_v37 = vmax.f32 %v1013_v35, %v1014_v36 }
0x1643   :  { %vm1016_vm2 = vcmp.eq.f32.partialorder %v1008_v30, %v1015_v37  ;;  %v1026_v38 = vadd.f32 %v1015_v37, %v1874_v51 }
0x1644   :  { %v1017_v39 = vsel %vm1016_vm2, %v1869_v42, 5.0 }
0x1645   :  { %v1018_v40 = vsel %vm833_vm13, %v1017_v39, inf  ;;  %v1028_v44 = vrot.slane %v1026_v38, 3 }
0x1646   :  { %v1019_v46 = vrot.slane %v1018_v40, 4 }
0x1647   :  { %1030 = vxpose.xlu1.b32.start.end [1/1] (short) (narrow) %v1028_v44, 8 }
0x1648   :  { %v1020_v47 = vmin.f32 %v1018_v40, %v1019_v46 }
0x164a   :  { %v1021_v50 = vrot.slane %v1020_v47, 2 }
0x164c   :  { %v1022_v48 = vmin.f32 %v1020_v47, %v1021_v50 }
0x164e   :  { %v1023_v52 = vrot.slane %v1022_v48, 1 }
0x1650   :  { %v1024_v53 = vmin.f32 %v1022_v48, %v1023_v52 }
0x1652   :  { %1025 = vst.msk [vmem:[#allocation4 + $0x3] sm:$0x1] %vm850_vm14, %v1024_v53 }
0x169a   :  { %1460 = vset.pattern.permute.xlu1 %v1607_v10 }
0x16eb   :  { %v1046_v45 = vpop.trf.xlu1 }
0x16ec   :  { %1064 = vperm.xlu1 %1460, %v1046_v45   ;;  %v1263_v45 = vld [vmem:[%s1971_s4 + $0x3] sm:$0x1] }
0x175e   :  { %v1065_v54 = vpop.permute.xlu1 %1064 }
0x175f   :  { %v1067_v55 = vadd.f32 %v1065_v54, %v1865_v31  ;;  %v1265_v54 = vrot.slane %v1263_v45, 1 }
0x1761   :  { %v1068_v56 = vsel %vm833_vm13, %v1067_v55, -inf }
0x1762   :  { %v1069_v57 = vrot.slane %v1068_v56, 4 }
0x1764   :  { %v1070_v58 = vmax.f32 %v1068_v56, %v1069_v57 }
0x1766   :  { %v1071_v59 = vrot.slane %v1070_v58, 2 }
0x1768   :  { %v1072_v16 = vmax.f32 %v1070_v58, %v1071_v59 }
0x176a   :  { %v1073_v60 = vrot.slane %v1072_v16, 1 }
0x176c   :  { %v1074_v49 = vmax.f32 %v1072_v16, %v1073_v60 }
0x176e   :  { %vm1075_vm3 = vcmp.eq.f32.partialorder %v1067_v55, %v1074_v49  ;;  %v1085_v17 = vadd.f32 %v1074_v49, %v1874_v51 }
0x176f   :  { %v1076_v61 = vsel %vm1075_vm3, %v1869_v42, 5.0 }
0x1770   :  { %v1077_v10 = vsel %vm833_vm13, %v1076_v61, inf  ;;  %v1087_v62 = vrot.slane %v1085_v17, 4 }
0x1771   :  { %v1078_v63 = vrot.slane %v1077_v10, 4 }
0x1772   :  { %1089 = vxpose.xlu2.b32.start.end [1/1] (short) (narrow) %v1087_v62, 8 }
0x1773   :  { %v1079_v0 = vmin.f32 %v1077_v10, %v1078_v63 }
0x1775   :  { %v1080_v43 = vrot.slane %v1079_v0, 2 }
0x1777   :  { %v1081_v1 = vmin.f32 %v1079_v0, %v1080_v43 }
0x1779   :  { %v1082_v2 = vrot.slane %v1081_v1, 1 }
0x177b   :  { %v1083_v3 = vmin.f32 %v1081_v1, %v1082_v2 }
0x177d   :  { %1084 = vst.msk [vmem:[#allocation4 + $0x4] sm:$0x1] %vm850_vm14, %v1083_v3 }
0x180b   :  { %v1105_v4 = vpop.trf.xlu2 }
0x180c   :  { %1123 = vperm.xlu1 %1460, %v1105_v4  }
0x187e   :  { %v1124_v5 = vpop.permute.xlu1 %1123 }
0x187f   :  { %v1126_v7 = vadd.f32 %v1124_v5, %v1865_v31 }
0x1881   :  { %v1127_v8 = vsel %vm833_vm13, %v1126_v7, -inf }
0x1882   :  { %v1128_v11 = vrot.slane %v1127_v8, 4 }
0x1884   :  { %v1129_v12 = vmax.f32 %v1127_v8, %v1128_v11 }
0x1886   :  { %v1130_v13 = vrot.slane %v1129_v12, 2 }
0x1888   :  { %v1131_v14 = vmax.f32 %v1129_v12, %v1130_v13  ;;  %v1609_v13 = vmov 0.0  }
0x188a   :  { %v1132_v18 = vrot.slane %v1131_v14, 1 }
0x188c   :  { %v1133_v20 = vmax.f32 %v1131_v14, %v1132_v18 }
0x188e   :  { %vm1134_vm4 = vcmp.eq.f32.partialorder %v1126_v7, %v1133_v20  ;;  %v1144_v21 = vadd.f32 %v1133_v20, %v1874_v51 }
0x188f   :  { %v1135_v9 = vsel %vm1134_vm4, %v1869_v42, 5.0 }
0x1890   :  { %v1136_v22 = vsel %vm833_vm13, %v1135_v9, inf  ;;  %v1146_v41 = vrot.slane %v1144_v21, 5 }
0x1891   :  { %v1137_v23 = vrot.slane %v1136_v22, 4 }
0x1892   :  { %1148 = vxpose.xlu1.b32.start.end [1/1] (short) (narrow) %v1146_v41, 8 }
0x1893   :  { %v1138_v24 = vmin.f32 %v1136_v22, %v1137_v23 }
0x1895   :  { %v1139_v25 = vrot.slane %v1138_v24, 2 }
0x1897   :  { %v1140_v26 = vmin.f32 %v1138_v24, %v1139_v25 }
0x1899   :  { %v1141_v27 = vrot.slane %v1140_v26, 1 }
0x189b   :  { %v1142_v28 = vmin.f32 %v1140_v26, %v1141_v27 }
0x189d   :  { %1143 = vst.msk [vmem:[#allocation4 + $0x5] sm:$0x1] %vm850_vm14, %v1142_v28 }
0x18a4   :  { %v1311_v26 = vld [vmem:[#allocation4 + $0x5] sm:$0x1] }
0x1936   :  { %v1164_v15 = vpop.trf.xlu1 }
0x1937   :  { %1182 = vperm.xlu0 %1458, %v1164_v15   ;;  %v1314_v15 = vrot.slane %v1311_v26, 1 }
0x19a9   :  { %v1183_v29 = vpop.permute.xlu0 %1182 }
0x19aa   :  { %v1185_v30 = vadd.f32 %v1183_v29, %v1865_v31 }
0x19ac   :  { %v1186_v19 = vsel %vm833_vm13, %v1185_v30, -inf }
0x19ad   :  { %v1187_v32 = vrot.slane %v1186_v19, 4 }
0x19af   :  { %v1188_v33 = vmax.f32 %v1186_v19, %v1187_v32  ;;  %v1324_v19 = vld [vmem:[#allocation4 + $0x4] sm:$0x1] }
0x19b1   :  { %v1189_v34 = vrot.slane %v1188_v33, 2 }
0x19b3   :  { %v1190_v35 = vmax.f32 %v1188_v33, %v1189_v34  ;;  %v1327_v34 = vrot.slane %v1324_v19, 1 }
0x19b5   :  { %v1191_v36 = vrot.slane %v1190_v35, 1 }
0x19b7   :  { %v1192_v37 = vmax.f32 %v1190_v35, %v1191_v36 }
0x19b9   :  { %vm1193_vm6 = vcmp.eq.f32.partialorder %v1185_v30, %v1192_v37  ;;  %v1203_v38 = vadd.f32 %v1192_v37, %v1874_v51  ;;  %v1336_v37 = vld [vmem:[#allocation4 + $0x3] sm:$0x1] }
0x19ba   :  { %v1194_v39 = vsel %vm1193_vm6, %v1869_v42, 5.0 }
0x19bb   :  { %v1195_v40 = vsel %vm833_vm13, %v1194_v39, inf  ;;  %v1205_v44 = vrot.slane %v1203_v38, 6 }
0x19bc   :  { %v1196_v46 = vrot.slane %v1195_v40, 4 }
0x19bd   :  { %1207 = vxpose.xlu2.b32.start.end [1/1] (short) (narrow) %v1205_v44, 8 }
0x19be   :  { %v1197_v47 = vmin.f32 %v1195_v40, %v1196_v46  ;;  %v1339_v40 = vrot.slane %v1336_v37, 1 }
0x19c0   :  { %v1198_v50 = vrot.slane %v1197_v47, 2 }
0x19c2   :  { %v1199_v48 = vmin.f32 %v1197_v47, %v1198_v50  ;;  %v1349_v47 = vld [vmem:[#allocation4 + $0x2] sm:$0x1] }
0x19c4   :  { %v1200_v52 = vrot.slane %v1199_v48, 1 }
0x19c6   :  { %v1201_v53 = vmin.f32 %v1199_v48, %v1200_v52  ;;  %v1352_v52 = vrot.slane %v1349_v47, 1 }
0x19c8   :  { %1202 = vst.msk [vmem:[#allocation4 + $0x6] sm:$0x1] %vm850_vm14, %v1201_v53 }
0x19cf   :  { %v1298_v9 = vld [vmem:[#allocation4 + $0x6] sm:$0x1] }
0x19d0   :  { %v1301_v23 = vrot.slane %v1298_v9, 1 }
0x1a26   :  { %1266 = vrot.lane.b32.xlu2 %v1265_v54, %s1608_s27  ;;  %v1362_v54 = vld [vmem:[#allocation4 + $0x1] sm:$0x1] }
0x1a56   :  { %v1223_v55 = vpop.trf.xlu2 }
0x1a57   :  { %1241 = vperm.xlu0 %1458, %v1223_v55  }
0x1a80   :  { %v1267_v10 = vpop.permute.xlu2 %1266 }
0x1ac9   :  { %v1242_v56 = vpop.permute.xlu0 %1241 }
0x1aca   :  { %v1244_v57 = vadd.f32 %v1242_v56, %v1865_v31 }
0x1acc   :  { %v1245_v58 = vsel %vm833_vm13, %v1244_v57, -inf }
0x1acd   :  { %v1246_v59 = vrot.slane %v1245_v58, 4 }
0x1acf   :  { %v1247_v16 = vmax.f32 %v1245_v58, %v1246_v59 }
0x1ad1   :  { %v1248_v60 = vrot.slane %v1247_v16, 2 }
0x1ad3   :  { %v1249_v49 = vmax.f32 %v1247_v16, %v1248_v60 }
0x1ad5   :  { %v1250_v17 = vrot.slane %v1249_v49, 1 }
0x1ad7   :  { %v1251_v61 = vmax.f32 %v1249_v49, %v1250_v17 }
0x1ad9   :  { %vm1252_vm7 = vcmp.eq.f32.partialorder %v1244_v57, %v1251_v61  ;;  %v1262_v62 = vadd.f32 %v1251_v61, %v1874_v51  ;;  %v1365_v57 = vrot.slane %v1362_v54, 1 }
0x1ada   :  { %v1253_v63 = vsel %vm1252_vm7, %v1869_v42, 5.0 }
0x1adb   :  { %v1254_v0 = vsel %vm833_vm13, %v1253_v63, inf  ;;  %v1269_v43 = vadd.f32 %v1267_v10, %v1262_v62 }
0x1adc   :  { %v1255_v1 = vrot.slane %v1254_v0, 4 }
0x1add   :  { %v1271_v31 = vsel %vm1270_vm5, %v1269_v43, -inf }
0x1ade   :  { %v1256_v2 = vmin.f32 %v1254_v0, %v1255_v1  ;;  %1272 = vmax.xlane.f32.xlu0 %v1271_v31 }
0x1ae0   :  { %v1257_v3 = vrot.slane %v1256_v2, 2 }
0x1ae2   :  { %v1258_v4 = vmin.f32 %v1256_v2, %v1257_v3 }
0x1ae4   :  { %v1259_v5 = vrot.slane %v1258_v4, 1 }
0x1ae6   :  { %v1260_v7 = vmin.f32 %v1258_v4, %v1259_v5 }
0x1ae8   :  { %1261 = vst.msk [vmem:[#allocation4 + $0x7] sm:$0x1] %vm850_vm14, %v1260_v7 }
0x1aef   :  { %v1285_v11 = vld [vmem:[#allocation4 + $0x7] sm:$0x1] }
0x1af0   :  { %v1288_v18 = vrot.slane %v1285_v11, 1 }
0x1b51   :  { %v1273_v8 = vpop.xlane.xlu0 %1272 }
0x1b52   :  { %vm1274_vm10 = vcmp.eq.f32.partialorder %v1269_v43, %v1273_v8  ;;  %1282 = vst.msk [vmem:[#allocation9 - $0x7] sm:$0x80] %vm1281_vm8, %v1273_v8 }
0x1b53   :  { %v1275_v42 = vsel %vm1274_vm10, %v1826_v6, 5.0 }
0x1b54   :  { %v1276_v51 = vsel %vm1270_vm5, %v1275_v42, inf }
0x1b55   :  { %1277 = vmin.xlane.f32.xlu1 %v1276_v51 }
0x1bc8   :  { %v1927_v12 = vpop.xlane.xlu1 %1277 }
0x1bc9   :  { %vm1279_vm11 = vcmp.eq.f32.partialorder %v1826_v6, %v1927_v12 }
0x1bca   :  { %v1280_v14 = vsel %vm1279_vm11, 1.0, %v1609_v13  ;;  %vm1283_vm11 = vcmp.eq.f32.partialorder %v1826_v6, 7.0 }
0x1bcb   :  { %vm1286_vm12 = vcmp.gt.f32.partialorder %v1280_v14, 0.5  ;;  %v1284_v16 = vsel %vm1283_vm11, %v1927_v12, 0.0 }
0x1bcc   :  { %v1290_v20 = vsel %vm1286_vm12, %v1288_v18, -1.0  ;;  %vm1296_vm12 = vcmp.eq.f32.partialorder %v1826_v6, 6.0 }
0x1bcd   :  { %v1291_v21 = vsel %vm1270_vm5, %v1290_v20, -inf }
0x1bce   :  { %1292 = vmax.xlane.f32.xlu0 %v1291_v21 }
0x1c41   :  { %v1932_v22 = vpop.xlane.xlu0 %1292 }
0x1c42   :  { %vm1294_vm13 = vcmp.eq.f32.partialorder %v1826_v6, %v1932_v22  ;;  %v1297_v60 = vsel %vm1296_vm12, %v1932_v22, %v1284_v16 }
0x1c43   :  { %v1295_v41 = vsel %vm1294_vm13, 1.0, %v1609_v13  ;;  %vm1309_vm13 = vcmp.eq.f32.partialorder %v1826_v6, 5.0 }
0x1c44   :  { %vm1299_vm14 = vcmp.gt.f32.partialorder %v1295_v41, 0.5 }
0x1c45   :  { %v1303_v24 = vsel %vm1299_vm14, %v1301_v23, -1.0  ;;  %vm1322_vm14 = vcmp.eq.f32.partialorder %v1826_v6, 4.0 }
0x1c46   :  { %v1304_v25 = vsel %vm1270_vm5, %v1303_v24, -inf }
0x1c47   :  { %1305 = vmax.xlane.f32.xlu0 %v1304_v25 }
0x1cba   :  { %v1306_v27 = vpop.xlane.xlu0 %1305 }
0x1cbb   :  { %vm1307_vm15 = vcmp.eq.f32.partialorder %v1826_v6, %v1306_v27  ;;  %v1310_v49 = vsel %vm1309_vm13, %v1306_v27, %v1297_v60 }
0x1cbc   :  { %v1308_v28 = vsel %vm1307_vm15, 1.0, %v1609_v13  ;;  %vm1347_vm15 = vcmp.eq.f32.partialorder %v1826_v6, 2.0 }
0x1cbd   :  { %vm1312_vm0 = vcmp.gt.f32.partialorder %v1308_v28, 0.5 }
0x1cbe   :  { %v1316_v29 = vsel %vm1312_vm0, %v1314_v15, -1.0  ;;  %vm1360_vm0 = vcmp.eq.f32.partialorder %v1826_v6, 1.0 }
0x1cbf   :  { %v1317_v30 = vsel %vm1270_vm5, %v1316_v29, -inf }
0x1cc0   :  { %1318 = vmax.xlane.f32.xlu0 %v1317_v30 }
0x1d33   :  { %v1319_v32 = vpop.xlane.xlu0 %1318 }
0x1d34   :  { %vm1320_vm1 = vcmp.eq.f32.partialorder %v1826_v6, %v1319_v32  ;;  %v1323_v17 = vsel %vm1322_vm14, %v1319_v32, %v1310_v49 }
0x1d35   :  { %v1321_v33 = vsel %vm1320_vm1, 1.0, %v1609_v13 }
0x1d36   :  { %vm1325_vm2 = vcmp.gt.f32.partialorder %v1321_v33, 0.5 }
0x1d37   :  { %v1329_v35 = vsel %vm1325_vm2, %v1327_v34, -1.0 }
0x1d38   :  { %v1330_v36 = vsel %vm1270_vm5, %v1329_v35, -inf }
0x1d39   :  { %1331 = vmax.xlane.f32.xlu0 %v1330_v36 }
0x1dac   :  { %v1332_v38 = vpop.xlane.xlu0 %1331 }
0x1dad   :  { %vm1333_vm3 = vcmp.eq.f32.partialorder %v1826_v6, %v1332_v38  ;;  %v1335_v61 = vsel %vm792_vm9, %v1332_v38, %v1323_v17  ;;  %vm1374_vm9 = vcmask 64519  }
0x1dae   :  { %v1334_v39 = vsel %vm1333_vm3, 1.0, %v1609_v13 }
0x1daf   :  { %vm1337_vm4 = vcmp.gt.f32.partialorder %v1334_v39, 0.5 }
0x1db0   :  { %v1341_v44 = vsel %vm1337_vm4, %v1339_v40, -1.0 }
0x1db1   :  { %v1342_v46 = vsel %vm1270_vm5, %v1341_v44, -inf }
0x1db2   :  { %1343 = vmax.xlane.f32.xlu0 %v1342_v46 }
0x1e25   :  { %v1344_v50 = vpop.xlane.xlu0 %1343 }
0x1e26   :  { %vm1345_vm6 = vcmp.eq.f32.partialorder %v1826_v6, %v1344_v50  ;;  %v1348_v10 = vsel %vm1347_vm15, %v1344_v50, %v1335_v61 }
0x1e27   :  { %v1346_v48 = vsel %vm1345_vm6, 1.0, %v1609_v13 }
0x1e28   :  { %vm1350_vm7 = vcmp.gt.f32.partialorder %v1346_v48, 0.5 }
0x1e29   :  { %v1354_v53 = vsel %vm1350_vm7, %v1352_v52, -1.0 }
0x1e2a   :  { %v1355_v45 = vsel %vm1270_vm5, %v1354_v53, -inf }
0x1e2b   :  { %1356 = vmax.xlane.f32.xlu0 %v1355_v45 }
0x1e9e   :  { %v1357_v55 = vpop.xlane.xlu0 %1356 }
0x1e9f   :  { %vm1358_vm8 = vcmp.eq.f32.partialorder %v1826_v6, %v1357_v55  ;;  %v1361_v62 = vsel %vm1360_vm0, %v1357_v55, %v1348_v10 }
0x1ea0   :  { %v1359_v56 = vsel %vm1358_vm8, 1.0, %v1609_v13 }
0x1ea1   :  { %vm1363_vm10 = vcmp.gt.f32.partialorder %v1359_v56, 0.5 }
0x1ea2   :  { %v1367_v58 = vsel %vm1363_vm10, %v1365_v57, -1.0 }
0x1ea3   :  { %v1368_v59 = vsel %vm1270_vm5, %v1367_v58, -inf  ;;  %vm1371_vm5 = vcmp.eq.f32.partialorder %v1826_v6, 0.0 }
0x1ea4   :  { %1369 = vmax.xlane.f32.xlu0 %v1368_v59 }
0x1f17   :  { %v1370_v63 = vpop.xlane.xlu0 %1369 }
0x1f18   :  { %v1372_v0 = vsel %vm1371_vm5, %v1370_v63, %v1361_v62 }
0x1f19   :  { %vm1443_vm1 = vcmp.lt.s32.totalorder %v1372_v0, 0  ;;  %v1444_v43 = vceil.f32 %v1372_v0  ;;  %v1445_v1 = vfloor.f32 %v1372_v0 }
0x1f1b   :  { %v1446_v6 = vsel %vm1443_vm1, %v1444_v43, %v1445_v1 }
0x1f1c   :  { %v1447_v31 = vcvt.f32.s32 %v1446_v6 }
0x1f1e   :  { %1375 = vst.msk [vmem:[#allocation7 - $0x7] sm:$0x80] %vm1374_vm9, %v1447_v31 }
0x1f1f   :  { %1397 = dma.vmem_to_hbm [thread:$0]  %s1393_s9, 16, %s1395_s10, [#allocation8]  }
0x1f20   :  { %1408 = dma.vmem_to_hbm [thread:$0]  %s1404_s12, 16, %s1406_s15, [#allocation8]  }
0x1f21   :  { %1599 = dma.done.wait [#allocation6], 128  }
0x1f22   :  { %1600 = vsyncadd [#allocation6], 4294967168 }
0x1f23   :  { %1601 = dma.done.wait [#allocation8], 32  }
0x1f24   :  { %1602 = vsyncadd [#allocation8], 4294967264 }
0x1f25   :  { %1421 = vsyncpa [#allocation6], 1 }
0x1f26   :  { %1422 = vsyncpa [#allocation8], 1 }

</bundles_post_ra>
